<compile_context>
chip_gen: v6e
topology: v6e:2x2x1
jax: 0.10.0
libtpu: 0.0.40
codegen_flags: <defaults>
</compile_context>

<pallas_src>
import jax
import jax.numpy as jnp
from jax.experimental import pallas as pl
from jax.experimental.pallas import tpu as pltpu

# (in_features, out_features) for the 7 linear layers (6 in `extract`, 1 in `predict`)
LAYER_DIMS = [(784, 512), (512, 256), (256, 128), (128, 64), (64, 32), (32, 2), (2, 10)]
NUM_PRELU = 6      # after L1..L5 of `extract`, and one at the start of `predict`
LANE = 128         # TPU lane width; tail layers are zero-padded to this
N_MXU_LAYERS = 6   # layers 0..5 run on the MXU; layer 6 (2->10) runs on the VPU


def _round_up(n, m):
    return ((n + m - 1) // m) * m


def _net_kernel(x_ref, slopes_ref, *refs):
    """args: x (TB,784) f32, slopes (6,) f32 in SMEM,
             then w1,b1,...,w6,b6 (weights bf16 / biases f32, layer-6 padded to 128),
             then w7 (2,128) f32, b7 (1,128) f32 (predict head, lanes 2..11),
             then out_ref (TB,128) f32: feature in lanes 0..1, log-probs in 2..11."""
    w_refs = [refs[2 * i] for i in range(N_MXU_LAYERS)]
    b_refs = [refs[2 * i + 1] for i in range(N_MXU_LAYERS)]
    w7_ref = refs[2 * N_MXU_LAYERS]
    b7_ref = refs[2 * N_MXU_LAYERS + 1]
    out_ref = refs[2 * N_MXU_LAYERS + 2]

    def linear(h_bf16, i):
        # bf16 x bf16 on the MXU, f32 accumulation.
        return jnp.dot(h_bf16, w_refs[i][...],
                       preferred_element_type=jnp.float32) + b_refs[i][...]

    def prelu(h, i):
        a = slopes_ref[i]  # scalar read from SMEM (single shared slope per PReLU)
        return jnp.where(h > 0, h, a * h)

    # Cast to bf16 in-kernel (VPU has slack); avoids a wrapper-side HBM copy.
    h = x_ref[...].astype(jnp.bfloat16)  # (TB, 784)

    # extract: 5 x (Linear + PReLU)
    for i in range(5):
        h = prelu(linear(h, i), i).astype(jnp.bfloat16)

    # extract: final Linear(32, 2); out dim zero-padded to 128 -> lane-dense slab.
    feature = linear(h, 5)               # (TB, 128) f32; lanes >= 2 are exactly 0

    # predict: PReLU -> Linear(2, 10) as two VPU broadcast-FMAs (no MXU pass).
    # w7/b7 were pre-shifted so the 10 logits land in lanes 2..11 of the slab.
    pf = prelu(feature, 5)               # f32 on the VPU
    z = (pf[:, 0:1] * w7_ref[0:1, :]
         + pf[:, 1:2] * w7_ref[1:2, :]
         + b7_ref[...])                  # (TB, 128) f32

    # log_softmax over the 10 real logits (mask the padded lanes).
    col = jax.lax.broadcasted_iota(jnp.int32, z.shape, 1)
    valid = jnp.logical_and(col >= 2, col < 12)
    z = jnp.where(valid, z, -1e30)
    m = jnp.max(z, axis=-1, keepdims=True)
    shifted = z - m
    lse = jnp.log(jnp.sum(jnp.exp(shifted), axis=-1, keepdims=True))
    logp = shifted - lse

    # Pack both outputs into one lane-dense slab: feature -> lanes 0..1,
    # log-probs -> lanes 2..11 (lanes >= 12 hold junk and are sliced away).
    out_ref[...] = jnp.where(col < 2, feature, logp).astype(out_ref.dtype)


def init_params(key):
    """Deterministic f32 parameter init mirroring the torch module's shapes."""
    ws, bs = [], []
    for fan_in, fan_out in LAYER_DIMS:
        key, kw, kb = jax.random.split(key, 3)
        bound = 1.0 / (fan_in ** 0.5)
        ws.append(jax.random.uniform(kw, (fan_in, fan_out), jnp.float32, -bound, bound))
        bs.append(jax.random.uniform(kb, (1, fan_out), jnp.float32, -bound, bound))
    slopes = jnp.full((NUM_PRELU,), 0.25, jnp.float32)  # torch PReLU default init
    return ws, bs, slopes


def prepare_params(ws, bs):
    """One-time conversion of the f32 torch-layout params into kernel layout
    (done outside the jitted forward so it is NOT re-paid every call)."""
    # Layers 0..4: plain bf16 weights, f32 biases.
    w_list = [jnp.asarray(ws[i], jnp.bfloat16) for i in range(5)]
    b_list = [jnp.asarray(bs[i], jnp.float32) for i in range(5)]
    # Layer 5 (32 -> 2): zero-pad the output dim to lane width 128.
    w_list.append(jnp.pad(ws[5], ((0, 0), (0, LANE - 2))).astype(jnp.bfloat16))
    b_list.append(jnp.pad(bs[5], ((0, 0), (0, LANE - 2))).astype(jnp.float32))
    # Layer 6 (2 -> 10): VPU head; shift the 10 real columns to lanes 2..11.
    w7 = jnp.pad(ws[6], ((0, 0), (2, LANE - 12))).astype(jnp.float32)  # (2, 128)
    b7 = jnp.pad(bs[6], ((0, 0), (2, LANE - 12))).astype(jnp.float32)  # (1, 128)
    return tuple(w_list), tuple(b_list), w7, b7


@jax.jit
def net_forward(x, kernel_ws, kernel_bs, w7, b7, slopes):
    # Glue: torch's x.view(-1, 784) (row-major flatten of NCHW) -- free reshape.
    x2d = x.reshape(-1, 784)
    B = x2d.shape[0]

    # Sublane alignment: only pad when B is not a multiple of 8 (<= 7 rows).
    B8 = _round_up(B, 8)
    if B8 != B:
        x2d = jnp.pad(x2d, ((0, B8 - B), (0, 0)))

    # Batch tile: multiple of 8; >= 2 grid steps whenever the batch allows it
    # (keeps both v7x TensorCores busy via "parallel"); grows to 512 at large
    # batch to amortize the ~0.35 us per-step overhead. Ragged last tile is
    # masked by Pallas (no wrapper-side pad to TB).
    if B8 <= 16:
        TB = B8
    else:
        TB = min(512, _round_up((B8 + 1) // 2, 8))
    grid = (pl.cdiv(B8, TB),)

    wb_args, wb_specs = [], []
    for w, b in zip(kernel_ws, kernel_bs):
        wb_args += [w, b]
        # Same block index every grid step -> weights/biases stay VMEM-resident.
        wb_specs += [pl.BlockSpec(w.shape, lambda i: (0, 0)),
                     pl.BlockSpec(b.shape, lambda i: (0, 0))]
    wb_args += [w7, b7]
    wb_specs += [pl.BlockSpec(w7.shape, lambda i: (0, 0)),
                 pl.BlockSpec(b7.shape, lambda i: (0, 0))]

    flops = 2 * B8 * (sum(fi * fo for fi, fo in LAYER_DIMS[:5]) + 32 * LANE + 2 * LANE)
    bytes_accessed = (x2d.size * 4
                      + sum(w.size * 2 for w in kernel_ws)
                      + sum(b.size * 4 for b in kernel_bs)
                      + (w7.size + b7.size) * 4
                      + B8 * LANE * 4)

    out_slab = pl.pallas_call(
        _net_kernel,
        out_shape=jax.ShapeDtypeStruct((B8, LANE), jnp.float32),
        grid=grid,
        in_specs=[
            pl.BlockSpec((TB, 784), lambda i: (i, 0)),            # batch-tiled f32 input
            pl.BlockSpec(memory_space=pltpu.MemorySpace.SMEM),    # 6 PReLU slopes
        ] + wb_specs,
        out_specs=pl.BlockSpec((TB, LANE), lambda i: (i, 0)),
        compiler_params=pltpu.CompilerParams(
            dimension_semantics=("parallel",),
            vmem_limit_bytes=32 * 1024 * 1024,
        ),
        cost_estimate=pl.CostEstimate(flops=flops,
                                      transcendentals=B8 * LANE,
                                      bytes_accessed=bytes_accessed),
    )(x2d, slopes, *wb_args)

    # Unpack the single lane-dense slab back into the module's two outputs.
    return out_slab[:B, :2], out_slab[:B, 2:12]


def reference_forward(x, ws, bs, slopes):
    """Pure-JAX reference mirroring the kernel's bf16-matmul numerics."""
    h = x.reshape(-1, 784).astype(jnp.bfloat16)
    for i in range(5):
        y = jnp.dot(h, ws[i].astype(jnp.bfloat16),
                    preferred_element_type=jnp.float32) + bs[i]
        y = jnp.where(y > 0, y, slopes[i] * y)
        h = y.astype(jnp.bfloat16)
    feature = jnp.dot(h, ws[5].astype(jnp.bfloat16),
                      preferred_element_type=jnp.float32) + bs[5]
    pf = jnp.where(feature > 0, feature, slopes[5] * feature)
    z = jnp.dot(pf, ws[6]) + bs[6]                       # predict head in f32
    pred = jax.nn.log_softmax(z, axis=-1)
    return feature, pred


if __name__ == "__main__":
    key = jax.random.PRNGKey(0)
    kx, kp = jax.random.split(key)

    # Small MNIST-like input; forward flattens to (-1, 784).
    x = jax.random.normal(kx, (8, 1, 28, 28), jnp.float32)
    ws, bs, slopes = init_params(kp)
    kernel_ws, kernel_bs, w7, b7 = prepare_params(ws, bs)

    feature, pred = net_forward(x, kernel_ws, kernel_bs, w7, b7, slopes)
    jax.block_until_ready((feature, pred))

    ref_feat, ref_pred = reference_forward(x, ws, bs, slopes)
    assert feature.shape == (8, 2) and pred.shape == (8, 10)
    assert jnp.allclose(feature, ref_feat, atol=2e-2, rtol=2e-2)
    assert jnp.allclose(pred, ref_pred, atol=2e-2, rtol=2e-2)

    print("KERNEL_OK")
</pallas_src>

<mosaic_0001>
module attributes {stable_mosaic.version = 11 : i64} {
  func.func @_net_kernel(%arg0: i32, %arg1: memref<8x784xf32, #tpu.memory_space<vmem>>, %arg2: memref<6xf32, #tpu.memory_space<smem>>, %arg3: memref<784x512xbf16, #tpu.memory_space<vmem>>, %arg4: memref<1x512xf32, #tpu.memory_space<vmem>>, %arg5: memref<512x256xbf16, #tpu.memory_space<vmem>>, %arg6: memref<1x256xf32, #tpu.memory_space<vmem>>, %arg7: memref<256x128xbf16, #tpu.memory_space<vmem>>, %arg8: memref<1x128xf32, #tpu.memory_space<vmem>>, %arg9: memref<128x64xbf16, #tpu.memory_space<vmem>>, %arg10: memref<1x64xf32, #tpu.memory_space<vmem>>, %arg11: memref<64x32xbf16, #tpu.memory_space<vmem>>, %arg12: memref<1x32xf32, #tpu.memory_space<vmem>>, %arg13: memref<32x128xbf16, #tpu.memory_space<vmem>>, %arg14: memref<1x128xf32, #tpu.memory_space<vmem>>, %arg15: memref<2x128xf32, #tpu.memory_space<vmem>>, %arg16: memref<1x128xf32, #tpu.memory_space<vmem>>, %arg17: memref<8x128xf32, #tpu.memory_space<vmem>>) attributes {dimension_semantics = [#tpu.dimension_semantics<parallel>], iteration_bounds = array<i64: 1>, scalar_prefetch = 0 : i64, scratch_operands = 0 : i64, tpu.core_type = #tpu.core_type<tc>, window_params = [{transform_indices = @transform_0, window_bounds = array<i64: 8, 784>}, {transform_indices = @transform_1, window_bounds = array<i64: 6>}, {pipeline_mode = #tpu.pipeline_mode<synchronous>, transform_indices = @transform_2, window_bounds = array<i64: 784, 512>}, {pipeline_mode = #tpu.pipeline_mode<synchronous>, transform_indices = @transform_3, window_bounds = array<i64: 1, 512>}, {pipeline_mode = #tpu.pipeline_mode<synchronous>, transform_indices = @transform_4, window_bounds = array<i64: 512, 256>}, {pipeline_mode = #tpu.pipeline_mode<synchronous>, transform_indices = @transform_5, window_bounds = array<i64: 1, 256>}, {pipeline_mode = #tpu.pipeline_mode<synchronous>, transform_indices = @transform_6, window_bounds = array<i64: 256, 128>}, {pipeline_mode = #tpu.pipeline_mode<synchronous>, transform_indices = @transform_7, window_bounds = array<i64: 1, 128>}, {pipeline_mode = #tpu.pipeline_mode<synchronous>, transform_indices = @transform_8, window_bounds = array<i64: 128, 64>}, {pipeline_mode = #tpu.pipeline_mode<synchronous>, transform_indices = @transform_9, window_bounds = array<i64: 1, 64>}, {pipeline_mode = #tpu.pipeline_mode<synchronous>, transform_indices = @transform_10, window_bounds = array<i64: 64, 32>}, {pipeline_mode = #tpu.pipeline_mode<synchronous>, transform_indices = @transform_11, window_bounds = array<i64: 1, 32>}, {pipeline_mode = #tpu.pipeline_mode<synchronous>, transform_indices = @transform_12, window_bounds = array<i64: 32, 128>}, {pipeline_mode = #tpu.pipeline_mode<synchronous>, transform_indices = @transform_13, window_bounds = array<i64: 1, 128>}, {pipeline_mode = #tpu.pipeline_mode<synchronous>, transform_indices = @transform_14, window_bounds = array<i64: 2, 128>}, {pipeline_mode = #tpu.pipeline_mode<synchronous>, transform_indices = @transform_15, window_bounds = array<i64: 1, 128>}, {transform_indices = @transform_16, window_bounds = array<i64: 8, 128>}]} {
    %c0 = arith.constant 0 : index
    %c0_0 = arith.constant 0 : index
    %0 = vector.load %arg1[%c0, %c0_0] : memref<8x784xf32, #tpu.memory_space<vmem>>, vector<8x784xf32>
    %1 = arith.truncf %0 : vector<8x784xf32> to vector<8x784xbf16>
    %c0_1 = arith.constant 0 : index
    %c0_2 = arith.constant 0 : index
    %2 = vector.load %arg3[%c0_1, %c0_2] : memref<784x512xbf16, #tpu.memory_space<vmem>>, vector<784x512xbf16>
    %cst = arith.constant dense<0.000000e+00> : vector<8x512xf32>
    %3 = tpu.matmul %1, %2, %cst {dimension_numbers = #tpu.dot_dimension_numbers<[1], [0], [0], [1], [0, 0, 1, 1], [], []>} : vector<8x784xbf16>, vector<784x512xbf16>, vector<8x512xf32> -> vector<8x512xf32>
    %c0_3 = arith.constant 0 : index
    %c0_4 = arith.constant 0 : index
    %4 = vector.load %arg4[%c0_3, %c0_4] : memref<1x512xf32, #tpu.memory_space<vmem>>, vector<1x512xf32>
    %5 = vector.broadcast %4 : vector<1x512xf32> to vector<8x512xf32>
    %6 = arith.addf %3, %5 : vector<8x512xf32>
    %c0_5 = arith.constant 0 : index
    %7 = memref.load %arg2[%c0_5] : memref<6xf32, #tpu.memory_space<smem>>
    %cst_6 = arith.constant 0.000000e+00 : f32
    %8 = vector.broadcast %cst_6 : f32 to vector<8x512xf32>
    %9 = arith.cmpf ogt, %6, %8 : vector<8x512xf32>
    %10 = vector.broadcast %7 : f32 to vector<8x512xf32>
    %11 = arith.mulf %10, %6 : vector<8x512xf32>
    %12 = arith.select %9, %6, %11 : vector<8x512xi1>, vector<8x512xf32>
    %13 = arith.truncf %12 : vector<8x512xf32> to vector<8x512xbf16>
    %c0_7 = arith.constant 0 : index
    %c0_8 = arith.constant 0 : index
    %14 = vector.load %arg5[%c0_7, %c0_8] : memref<512x256xbf16, #tpu.memory_space<vmem>>, vector<512x256xbf16>
    %cst_9 = arith.constant dense<0.000000e+00> : vector<8x256xf32>
    %15 = tpu.matmul %13, %14, %cst_9 {dimension_numbers = #tpu.dot_dimension_numbers<[1], [0], [0], [1], [0, 0, 1, 1], [], []>} : vector<8x512xbf16>, vector<512x256xbf16>, vector<8x256xf32> -> vector<8x256xf32>
    %c0_10 = arith.constant 0 : index
    %c0_11 = arith.constant 0 : index
    %16 = vector.load %arg6[%c0_10, %c0_11] : memref<1x256xf32, #tpu.memory_space<vmem>>, vector<1x256xf32>
    %17 = vector.broadcast %16 : vector<1x256xf32> to vector<8x256xf32>
    %18 = arith.addf %15, %17 : vector<8x256xf32>
    %c1 = arith.constant 1 : index
    %19 = memref.load %arg2[%c1] : memref<6xf32, #tpu.memory_space<smem>>
    %cst_12 = arith.constant 0.000000e+00 : f32
    %20 = vector.broadcast %cst_12 : f32 to vector<8x256xf32>
    %21 = arith.cmpf ogt, %18, %20 : vector<8x256xf32>
    %22 = vector.broadcast %19 : f32 to vector<8x256xf32>
    %23 = arith.mulf %22, %18 : vector<8x256xf32>
    %24 = arith.select %21, %18, %23 : vector<8x256xi1>, vector<8x256xf32>
    %25 = arith.truncf %24 : vector<8x256xf32> to vector<8x256xbf16>
    %c0_13 = arith.constant 0 : index
    %c0_14 = arith.constant 0 : index
    %26 = vector.load %arg7[%c0_13, %c0_14] : memref<256x128xbf16, #tpu.memory_space<vmem>>, vector<256x128xbf16>
    %cst_15 = arith.constant dense<0.000000e+00> : vector<8x128xf32>
    %27 = tpu.matmul %25, %26, %cst_15 {dimension_numbers = #tpu.dot_dimension_numbers<[1], [0], [0], [1], [0, 0, 1, 1], [], []>} : vector<8x256xbf16>, vector<256x128xbf16>, vector<8x128xf32> -> vector<8x128xf32>
    %c0_16 = arith.constant 0 : index
    %c0_17 = arith.constant 0 : index
    %28 = vector.load %arg8[%c0_16, %c0_17] : memref<1x128xf32, #tpu.memory_space<vmem>>, vector<1x128xf32>
    %29 = vector.broadcast %28 : vector<1x128xf32> to vector<8x128xf32>
    %30 = arith.addf %27, %29 : vector<8x128xf32>
    %c2 = arith.constant 2 : index
    %31 = memref.load %arg2[%c2] : memref<6xf32, #tpu.memory_space<smem>>
    %cst_18 = arith.constant 0.000000e+00 : f32
    %32 = vector.broadcast %cst_18 : f32 to vector<8x128xf32>
    %33 = arith.cmpf ogt, %30, %32 : vector<8x128xf32>
    %34 = vector.broadcast %31 : f32 to vector<8x128xf32>
    %35 = arith.mulf %34, %30 : vector<8x128xf32>
    %36 = arith.select %33, %30, %35 : vector<8x128xi1>, vector<8x128xf32>
    %37 = arith.truncf %36 : vector<8x128xf32> to vector<8x128xbf16>
    %c0_19 = arith.constant 0 : index
    %c0_20 = arith.constant 0 : index
    %38 = vector.load %arg9[%c0_19, %c0_20] : memref<128x64xbf16, #tpu.memory_space<vmem>>, vector<128x64xbf16>
    %cst_21 = arith.constant dense<0.000000e+00> : vector<8x64xf32>
    %39 = tpu.matmul %37, %38, %cst_21 {dimension_numbers = #tpu.dot_dimension_numbers<[1], [0], [0], [1], [0, 0, 1, 1], [], []>} : vector<8x128xbf16>, vector<128x64xbf16>, vector<8x64xf32> -> vector<8x64xf32>
    %c0_22 = arith.constant 0 : index
    %c0_23 = arith.constant 0 : index
    %40 = vector.load %arg10[%c0_22, %c0_23] : memref<1x64xf32, #tpu.memory_space<vmem>>, vector<1x64xf32>
    %41 = vector.broadcast %40 : vector<1x64xf32> to vector<8x64xf32>
    %42 = arith.addf %39, %41 : vector<8x64xf32>
    %c3 = arith.constant 3 : index
    %43 = memref.load %arg2[%c3] : memref<6xf32, #tpu.memory_space<smem>>
    %cst_24 = arith.constant 0.000000e+00 : f32
    %44 = vector.broadcast %cst_24 : f32 to vector<8x64xf32>
    %45 = arith.cmpf ogt, %42, %44 : vector<8x64xf32>
    %46 = vector.broadcast %43 : f32 to vector<8x64xf32>
    %47 = arith.mulf %46, %42 : vector<8x64xf32>
    %48 = arith.select %45, %42, %47 : vector<8x64xi1>, vector<8x64xf32>
    %49 = arith.truncf %48 : vector<8x64xf32> to vector<8x64xbf16>
    %c0_25 = arith.constant 0 : index
    %c0_26 = arith.constant 0 : index
    %50 = vector.load %arg11[%c0_25, %c0_26] : memref<64x32xbf16, #tpu.memory_space<vmem>>, vector<64x32xbf16>
    %cst_27 = arith.constant dense<0.000000e+00> : vector<8x32xf32>
    %51 = tpu.matmul %49, %50, %cst_27 {dimension_numbers = #tpu.dot_dimension_numbers<[1], [0], [0], [1], [0, 0, 1, 1], [], []>} : vector<8x64xbf16>, vector<64x32xbf16>, vector<8x32xf32> -> vector<8x32xf32>
    %c0_28 = arith.constant 0 : index
    %c0_29 = arith.constant 0 : index
    %52 = vector.load %arg12[%c0_28, %c0_29] : memref<1x32xf32, #tpu.memory_space<vmem>>, vector<1x32xf32>
    %53 = vector.broadcast %52 : vector<1x32xf32> to vector<8x32xf32>
    %54 = arith.addf %51, %53 : vector<8x32xf32>
    %c4 = arith.constant 4 : index
    %55 = memref.load %arg2[%c4] : memref<6xf32, #tpu.memory_space<smem>>
    %cst_30 = arith.constant 0.000000e+00 : f32
    %56 = vector.broadcast %cst_30 : f32 to vector<8x32xf32>
    %57 = arith.cmpf ogt, %54, %56 : vector<8x32xf32>
    %58 = vector.broadcast %55 : f32 to vector<8x32xf32>
    %59 = arith.mulf %58, %54 : vector<8x32xf32>
    %60 = arith.select %57, %54, %59 : vector<8x32xi1>, vector<8x32xf32>
    %61 = arith.truncf %60 : vector<8x32xf32> to vector<8x32xbf16>
    %c0_31 = arith.constant 0 : index
    %c0_32 = arith.constant 0 : index
    %62 = vector.load %arg13[%c0_31, %c0_32] : memref<32x128xbf16, #tpu.memory_space<vmem>>, vector<32x128xbf16>
    %cst_33 = arith.constant dense<0.000000e+00> : vector<8x128xf32>
    %63 = tpu.matmul %61, %62, %cst_33 {dimension_numbers = #tpu.dot_dimension_numbers<[1], [0], [0], [1], [0, 0, 1, 1], [], []>} : vector<8x32xbf16>, vector<32x128xbf16>, vector<8x128xf32> -> vector<8x128xf32>
    %c0_34 = arith.constant 0 : index
    %c0_35 = arith.constant 0 : index
    %64 = vector.load %arg14[%c0_34, %c0_35] : memref<1x128xf32, #tpu.memory_space<vmem>>, vector<1x128xf32>
    %65 = vector.broadcast %64 : vector<1x128xf32> to vector<8x128xf32>
    %66 = arith.addf %63, %65 : vector<8x128xf32>
    %c5 = arith.constant 5 : index
    %67 = memref.load %arg2[%c5] : memref<6xf32, #tpu.memory_space<smem>>
    %cst_36 = arith.constant 0.000000e+00 : f32
    %68 = vector.broadcast %cst_36 : f32 to vector<8x128xf32>
    %69 = arith.cmpf ogt, %66, %68 : vector<8x128xf32>
    %70 = vector.broadcast %67 : f32 to vector<8x128xf32>
    %71 = arith.mulf %70, %66 : vector<8x128xf32>
    %72 = arith.select %69, %66, %71 : vector<8x128xi1>, vector<8x128xf32>
    %73 = vector.extract_strided_slice %72 {offsets = [0, 0], sizes = [8, 1], strides = [1, 1]} : vector<8x128xf32> to vector<8x1xf32>
    %c0_37 = arith.constant 0 : index
    %c0_38 = arith.constant 0 : index
    %74 = vector.load %arg15[%c0_37, %c0_38] : memref<2x128xf32, #tpu.memory_space<vmem>>, vector<1x128xf32>
    %75 = vector.broadcast %73 : vector<8x1xf32> to vector<8x128xf32>
    %76 = vector.broadcast %74 : vector<1x128xf32> to vector<8x128xf32>
    %77 = arith.mulf %75, %76 : vector<8x128xf32>
    %78 = vector.extract_strided_slice %72 {offsets = [0, 1], sizes = [8, 1], strides = [1, 1]} : vector<8x128xf32> to vector<8x1xf32>
    %c1_39 = arith.constant 1 : index
    %c0_40 = arith.constant 0 : index
    %79 = vector.load %arg15[%c1_39, %c0_40] : memref<2x128xf32, #tpu.memory_space<vmem>>, vector<1x128xf32>
    %80 = vector.broadcast %78 : vector<8x1xf32> to vector<8x128xf32>
    %81 = vector.broadcast %79 : vector<1x128xf32> to vector<8x128xf32>
    %82 = arith.mulf %80, %81 : vector<8x128xf32>
    %83 = arith.addf %77, %82 : vector<8x128xf32>
    %c0_41 = arith.constant 0 : index
    %c0_42 = arith.constant 0 : index
    %84 = vector.load %arg16[%c0_41, %c0_42] : memref<1x128xf32, #tpu.memory_space<vmem>>, vector<1x128xf32>
    %85 = vector.broadcast %84 : vector<1x128xf32> to vector<8x128xf32>
    %86 = arith.addf %83, %85 : vector<8x128xf32>
    %87 = tpu.iota {dimensions = array<i32: 1>} : vector<8x128xi32>
    %c2_i32 = arith.constant 2 : i32
    %88 = vector.broadcast %c2_i32 : i32 to vector<8x128xi32>
    %89 = arith.cmpi sge, %87, %88 : vector<8x128xi32>
    %c12_i32 = arith.constant 12 : i32
    %90 = vector.broadcast %c12_i32 : i32 to vector<8x128xi32>
    %91 = arith.cmpi slt, %87, %90 : vector<8x128xi32>
    %92 = arith.andi %89, %91 : vector<8x128xi1>
    %cst_43 = arith.constant -1.000000e+30 : f32
    %93 = vector.broadcast %cst_43 : f32 to vector<8x128xf32>
    %94 = arith.select %92, %86, %93 : vector<8x128xi1>, vector<8x128xf32>
    %cst_44 = arith.constant dense<0xFF800000> : vector<8xf32>
    %95 = vector.multi_reduction <maximumf>, %94, %cst_44 [1] : vector<8x128xf32> to vector<8xf32>
    %96 = vector.shape_cast %95 : vector<8xf32> to vector<8x1xf32>
    %97 = vector.broadcast %96 : vector<8x1xf32> to vector<8x128xf32>
    %98 = arith.subf %94, %97 : vector<8x128xf32>
    %99 = math.exp %98 : vector<8x128xf32>
    %cst_45 = arith.constant dense<0.000000e+00> : vector<8xf32>
    %100 = vector.multi_reduction <add>, %99, %cst_45 [1] : vector<8x128xf32> to vector<8xf32>
    %101 = vector.shape_cast %100 : vector<8xf32> to vector<8x1xf32>
    %102 = math.log %101 : vector<8x1xf32>
    %103 = vector.broadcast %102 : vector<8x1xf32> to vector<8x128xf32>
    %104 = arith.subf %98, %103 : vector<8x128xf32>
    %c2_i32_46 = arith.constant 2 : i32
    %105 = vector.broadcast %c2_i32_46 : i32 to vector<8x128xi32>
    %106 = arith.cmpi slt, %87, %105 : vector<8x128xi32>
    %107 = arith.select %106, %66, %104 : vector<8x128xi1>, vector<8x128xf32>
    %c0_47 = arith.constant 0 : index
    %c0_48 = arith.constant 0 : index
    %108 = vector.load %arg17[%c0_47, %c0_48] : memref<8x128xf32, #tpu.memory_space<vmem>>, vector<8x128xf32>
    tpu.vector_store %arg17[%c0_47, %c0_48], %107 {strides = array<i32>} : memref<8x128xf32, #tpu.memory_space<vmem>>, vector<8x128xf32>,
    return
  }
  func.func @transform_0(%arg0: i32) -> (i32, i32) {
    %c0_i32 = arith.constant 0 : i32
    %c0_i32_0 = arith.constant 0 : i32
    return %arg0, %c0_i32 : i32, i32
  }
  func.func @transform_1(%arg0: i32) -> i32 {
    %c0_i32 = arith.constant 0 : i32
    %c0_i32_0 = arith.constant 0 : i32
    return %c0_i32 : i32
  }
  func.func @transform_2(%arg0: i32) -> (i32, i32) {
    %c0_i32 = arith.constant 0 : i32
    %c0_i32_0 = arith.constant 0 : i32
    %c0_i32_1 = arith.constant 0 : i32
    return %c0_i32, %c0_i32_0 : i32, i32
  }
  func.func @transform_3(%arg0: i32) -> (i32, i32) {
    %c0_i32 = arith.constant 0 : i32
    %c0_i32_0 = arith.constant 0 : i32
    %c0_i32_1 = arith.constant 0 : i32
    return %c0_i32, %c0_i32_0 : i32, i32
  }
  func.func @transform_4(%arg0: i32) -> (i32, i32) {
    %c0_i32 = arith.constant 0 : i32
    %c0_i32_0 = arith.constant 0 : i32
    %c0_i32_1 = arith.constant 0 : i32
    return %c0_i32, %c0_i32_0 : i32, i32
  }
  func.func @transform_5(%arg0: i32) -> (i32, i32) {
    %c0_i32 = arith.constant 0 : i32
    %c0_i32_0 = arith.constant 0 : i32
    %c0_i32_1 = arith.constant 0 : i32
    return %c0_i32, %c0_i32_0 : i32, i32
  }
  func.func @transform_6(%arg0: i32) -> (i32, i32) {
    %c0_i32 = arith.constant 0 : i32
    %c0_i32_0 = arith.constant 0 : i32
    %c0_i32_1 = arith.constant 0 : i32
    return %c0_i32, %c0_i32_0 : i32, i32
  }
  func.func @transform_7(%arg0: i32) -> (i32, i32) {
    %c0_i32 = arith.constant 0 : i32
    %c0_i32_0 = arith.constant 0 : i32
    %c0_i32_1 = arith.constant 0 : i32
    return %c0_i32, %c0_i32_0 : i32, i32
  }
  func.func @transform_8(%arg0: i32) -> (i32, i32) {
    %c0_i32 = arith.constant 0 : i32
    %c0_i32_0 = arith.constant 0 : i32
    %c0_i32_1 = arith.constant 0 : i32
    return %c0_i32, %c0_i32_0 : i32, i32
  }
  func.func @transform_9(%arg0: i32) -> (i32, i32) {
    %c0_i32 = arith.constant 0 : i32
    %c0_i32_0 = arith.constant 0 : i32
    %c0_i32_1 = arith.constant 0 : i32
    return %c0_i32, %c0_i32_0 : i32, i32
  }
  func.func @transform_10(%arg0: i32) -> (i32, i32) {
    %c0_i32 = arith.constant 0 : i32
    %c0_i32_0 = arith.constant 0 : i32
    %c0_i32_1 = arith.constant 0 : i32
    return %c0_i32, %c0_i32_0 : i32, i32
  }
  func.func @transform_11(%arg0: i32) -> (i32, i32) {
    %c0_i32 = arith.constant 0 : i32
    %c0_i32_0 = arith.constant 0 : i32
    %c0_i32_1 = arith.constant 0 : i32
    return %c0_i32, %c0_i32_0 : i32, i32
  }
  func.func @transform_12(%arg0: i32) -> (i32, i32) {
    %c0_i32 = arith.constant 0 : i32
    %c0_i32_0 = arith.constant 0 : i32
    %c0_i32_1 = arith.constant 0 : i32
    return %c0_i32, %c0_i32_0 : i32, i32
  }
  func.func @transform_13(%arg0: i32) -> (i32, i32) {
    %c0_i32 = arith.constant 0 : i32
    %c0_i32_0 = arith.constant 0 : i32
    %c0_i32_1 = arith.constant 0 : i32
    return %c0_i32, %c0_i32_0 : i32, i32
  }
  func.func @transform_14(%arg0: i32) -> (i32, i32) {
    %c0_i32 = arith.constant 0 : i32
    %c0_i32_0 = arith.constant 0 : i32
    %c0_i32_1 = arith.constant 0 : i32
    return %c0_i32, %c0_i32_0 : i32, i32
  }
  func.func @transform_15(%arg0: i32) -> (i32, i32) {
    %c0_i32 = arith.constant 0 : i32
    %c0_i32_0 = arith.constant 0 : i32
    %c0_i32_1 = arith.constant 0 : i32
    return %c0_i32, %c0_i32_0 : i32, i32
  }
  func.func @transform_16(%arg0: i32) -> (i32, i32) {
    %c0_i32 = arith.constant 0 : i32
    %c0_i32_0 = arith.constant 0 : i32
    return %arg0, %c0_i32 : i32, i32
  }
}

</mosaic_0001>

<bundles_post_ra>
// kernel: net_forward.1
= control target key start
LH: loop header
LB: loop body
LE: loop exit
PB: predicated region body
PF: predicated region fallthrough
CT: control target
= control target key end

     0   :  { %s4001_s0 = inlined_call_operand.vmem [shape: f32[8,784], index: 0, kind: input, shape index: {}]   ;;  %s4002_s1 = inlined_call_operand.vmem [shape: f32[6], index: 1, kind: input, shape index: {}]   ;;  %s4003_s2 = inlined_call_operand.hbm [shape: bf16[784,512], index: 2, kind: input, shape index: {}]   ;;  %s4004_s3 = inlined_call_operand.vmem [shape: f32[1,512], index: 3, kind: input, shape index: {}]   ;;  %s4005_s4 = inlined_call_operand.vmem [shape: bf16[512,256], index: 4, kind: input, shape index: {}]   ;;  %s4006_s5 = inlined_call_operand.vmem [shape: f32[1,256], index: 5, kind: input, shape index: {}]   ;;  %s4007_s6 = inlined_call_operand.vmem [shape: bf16[256,128], index: 6, kind: input, shape index: {}]   ;;  %s4008_s7 = inlined_call_operand.vmem [shape: f32[1,128], index: 7, kind: input, shape index: {}]   ;;  %s4009_s8 = inlined_call_operand.vmem [shape: bf16[128,64], index: 8, kind: input, shape index: {}]   ;;  %s4010_s9 = inlined_call_operand.vmem [shape: f32[1,64], index: 9, kind: input, shape index: {}]   ;;  %s4011_s10 = inlined_call_operand.vmem [shape: bf16[64,32], index: 10, kind: input, shape index: {}]   ;;  %s4012_s11 = inlined_call_operand.vmem [shape: f32[1,32], index: 11, kind: input, shape index: {}]   ;;  %s4013_s12 = inlined_call_operand.vmem [shape: bf16[32,128], index: 12, kind: input, shape index: {}]   ;;  %s4014_s13 = inlined_call_operand.vmem [shape: f32[1,128], index: 13, kind: input, shape index: {}]   ;;  %s4015_s14 = inlined_call_operand.vmem [shape: f32[2,128], index: 14, kind: input, shape index: {}]   ;;  %s4016_s15 = inlined_call_operand.vmem [shape: f32[1,128], index: 15, kind: input, shape index: {}]   ;;  %s4017_s16 = inlined_call_operand.vmem [shape: f32[8,128], index: 16, kind: output, shape index: {}]  }
   0x1   :  { %4019 = sst [smem:[#allocation8_spill]] %s4001_s0 }
   0x2   :  { %21 = vsyncpa [#allocation4], 0  ;;  %s31_s23 = sshll.u32 %s4002_s1, 4  ;;  %s32_s23 = int_to_ptr.vmem [resolvable:$true] %s31_s23 }
   0x3   :  { %22 = vsyncpa [#allocation3], 0  ;;  %s3464_s24 = scalar_lea.vmem %s32_s23, 16  ;;  %p3469_p1 = scmp.lt.s32.totalorder %s32_s23, %s32_s23 }
   0x4   :  { %p3465_p0 = scmp.ne.s32.totalorder %s32_s23, %s3464_s24  ;;  %p3470_p2 = scmp.lt.s32.totalorder %s3464_s24, %s3464_s24 }
   0x6   :  { %p3471_p3 = por %p3470_p2, %p3469_p1 }
   0x8   :  { %p3472_p4 = pnand %p3471_p3, %p3465_p0 }
   0xa   :  { %3475 = shalt.err (!%p3472_p4)
}
   0xb   :  { %s3500_s25 = smov [#allocation2]   ;;  %s3501_s26 = smov [#allocation5]  }
   0xc   :  { %34 = dma.vmem_to_smem %s32_s23, 16, %s3500_s25, [#allocation4]  }
   0xd   :  { %s40_s27 = sshll.u32 %s3501_s26, 4  ;;  %s41_s27 = int_to_ptr.vmem [resolvable:$true] %s40_s27 }
   0xe   :  { %s3484_s28 = scalar_lea.vmem %s41_s27, 25088  ;;  %p3489_p6 = scmp.lt.s32.totalorder %s41_s27, %s41_s27 }
   0xf   :  { %p3485_p5 = scmp.ne.s32.totalorder %s41_s27, %s3484_s28  ;;  %p3490_p7 = scmp.lt.s32.totalorder %s3484_s28, %s3484_s28 }
  0x11   :  { %p3491_p8 = por %p3490_p7, %p3489_p6 }
  0x13   :  { %p3492_p9 = pnand %p3491_p8, %p3485_p5 }
  0x15   :  { %3495 = shalt.err (!%p3492_p9)
}
  0x16   :  { %s3502_s1 = smov 256   ;;  %s3503_s29 = smov 16  }
  0x17   :  { %46 = dma.hbm_to_vmem [thread:$0]  %s4003_s2, 25088, %s41_s27, [#allocation3], %s3502_s1, %s3502_s1, %s3503_s29  }
  0x18   :  { %3496 = dma.done.wait [#allocation4], 16  }
  0x19   :  { %3497 = vsyncadd [#allocation4], 4294967280 }
  0x1a   :  { %3498 = dma.done.wait [#allocation3], 25088  }
  0x1b   :  { %3499 = vsyncadd [#allocation3], 4294942208 }
  0x1c   :  { %79 = sfence }
  0x1d   :  { %v3040_v0 = vld [vmem:[#allocation5 + $0xe4] ss:$16 sps:$4 sm:$0xff]   ;;  %v3504_v2 = vmov 0   ;;  %v3044_v3 = vld [vmem:[#allocation5 + $0xe0] ss:$16 sps:$4 sm:$0xff]   ;;  %s4020_s18 = sld [smem:[#allocation8_spill]] }
  0x1e   :  { %v3042_v1 = vld [vmem:[#allocation5 + $0x2e4] ss:$16 sps:$4 sm:$0xff]   ;;  %3038 = vset.pattern.permute.xlu0 %v3504_v2  ;;  %1297 = vmatprep.subr.bf16.mxu0 %v3040_v0  ;;  %v3045_v4 = vld [vmem:[#allocation5 + $0x2e0] ss:$16 sps:$4 sm:$0xff]   ;;  %vm1293_vm0 = vcmask 130048   ;;  %s2907_s1 = sld [smem:[#allocation2 + $0x1]] }
  0x1f   :  { %1338 = vmatprep.subr.bf16.mxu1 %v3042_v1  ;;  %v3046_v5 = vld [vmem:[#allocation5 + $0xc4] ss:$16 sps:$4 sm:$0xff]   ;;  %1298 = vmatpush1.bf16.msra.mxu0 %v3044_v3  ;;  %v3050_v7 = vld [vmem:[#allocation5 + $0xc0] ss:$16 sps:$4 sm:$0xff]   ;;  %vm3506_vm7 = vmmov 0   ;;  %vm2468_vm10 = vcmask 523264  }
  0x20   :  { %1339 = vmatpush1.bf16.msra.mxu1 %v3045_v4  ;;  %v3048_v6 = vld [vmem:[#allocation5 + $0x2c4] ss:$16 sps:$4 sm:$0xff]   ;;  %1299 = vmatprep.subr.bf16.mxu0 %v3046_v5  ;;  %v3051_v8 = vld [vmem:[#allocation5 + $0x2c0] ss:$16 sps:$4 sm:$0xff]   ;;  %vm2541_vm12 = vcmask 261120   ;;  %s2947_s30 = sld [smem:[#allocation2 + $0x5]] }
  0x21   :  { %1340 = vmatprep.subr.bf16.mxu1 %v3048_v6  ;;  %v3052_v9 = vld [vmem:[#allocation5 + $0xa4] ss:$16 sps:$4 sm:$0xff]   ;;  %v3056_v11 = vld [vmem:[#allocation5 + $0xa0] ss:$16 sps:$4 sm:$0xff]  }
  0x22   :  { %v3054_v10 = vld [vmem:[#allocation5 + $0x2a4] ss:$16 sps:$4 sm:$0xff]   ;;  %v3057_v12 = vld [vmem:[#allocation5 + $0x2a0] ss:$16 sps:$4 sm:$0xff]  }
  0x23   :  { %1300 = vmatpush1.bf16.msra.mxu0 %v3050_v7  ;;  %v3058_v13 = vld [vmem:[#allocation5 + $0x84] ss:$16 sps:$4 sm:$0xff]   ;;  %v3062_v15 = vld [vmem:[#allocation5 + $0x80] ss:$16 sps:$4 sm:$0xff]   ;;  %v82_v47 = vld [vmem:[%s4020_s18 + $0x8] sm:$0xff] }
  0x24   :  { %1341 = vmatpush1.bf16.msra.mxu1 %v3051_v8  ;;  %1301 = vmatprep.subr.bf16.mxu0 %v3052_v9  ;;  %v3060_v14 = vld [vmem:[#allocation5 + $0x284] ss:$16 sps:$4 sm:$0xff]   ;;  %v3063_v16 = vld [vmem:[#allocation5 + $0x280] ss:$16 sps:$4 sm:$0xff]   ;;  %v3603_v50 = vpack.c.bf16 %v82_v47, %v82_v47  ;;  %v84_v51 = vld [vmem:[%s4020_s18 + $0x18] sm:$0xff] }
  0x25   :  { %1342 = vmatprep.subr.bf16.mxu1 %v3054_v10  ;;  %v3064_v17 = vld [vmem:[#allocation5 + $0x64] ss:$16 sps:$4 sm:$0xff]   ;;  %v3068_v19 = vld [vmem:[#allocation5 + $0x60] ss:$16 sps:$4 sm:$0xff]   ;;  %v3608_v53 = vpack.c.bf16 %v84_v51, %v84_v51 }
  0x26   :  { %v3066_v18 = vld [vmem:[#allocation5 + $0x264] ss:$16 sps:$4 sm:$0xff]   ;;  %v3069_v20 = vld [vmem:[#allocation5 + $0x260] ss:$16 sps:$4 sm:$0xff]   ;;  %1329 = vmatprep.mubr.bf16.mxu0 %v3603_v50 }
  0x27   :  { %1302 = vmatpush1.bf16.msra.mxu0 %v3056_v11  ;;  %v3070_v21 = vld [vmem:[#allocation5 + $0x44] ss:$16 sps:$4 sm:$0xff]   ;;  %v3074_v23 = vld [vmem:[#allocation5 + $0x40] ss:$16 sps:$4 sm:$0xff]   ;;  %1370 = vmatprep.mubr.bf16.mxu1 %v3608_v53 }
  0x28   :  { %1343 = vmatpush1.bf16.msra.mxu1 %v3057_v12  ;;  %1303 = vmatprep.subr.bf16.mxu0 %v3058_v13  ;;  %v3072_v22 = vld [vmem:[#allocation5 + $0x244] ss:$16 sps:$4 sm:$0xff]   ;;  %v3075_v24 = vld [vmem:[#allocation5 + $0x240] ss:$16 sps:$4 sm:$0xff]  }
  0x29   :  { %1344 = vmatprep.subr.bf16.mxu1 %v3060_v14  ;;  %v3076_v25 = vld [vmem:[#allocation5 + $0x24] ss:$16 sps:$4 sm:$0xff]   ;;  %v3080_v27 = vld [vmem:[#allocation5 + $0x20] ss:$16 sps:$4 sm:$0xff]  }
  0x2a   :  { %v3078_v26 = vld [vmem:[#allocation5 + $0x224] ss:$16 sps:$4 sm:$0xff]   ;;  %v3081_v28 = vld [vmem:[#allocation5 + $0x220] ss:$16 sps:$4 sm:$0xff]  }
  0x2b   :  { %1304 = vmatpush1.bf16.msra.mxu0 %v3062_v15  ;;  %v3082_v29 = vld [vmem:[#allocation5 + $0x4] ss:$16 sps:$4 sm:$0xff]   ;;  %v3086_v31 = vld [vmem:[#allocation5] ss:$16 sps:$4 sm:$0xff]   ;;  %v3147_v15 = vld [vmem:[#allocation5 + $0xec] ss:$16 sps:$4 sm:$0xff]  }
  0x2c   :  { %1345 = vmatpush1.bf16.msra.mxu1 %v3063_v16  ;;  %1305 = vmatprep.subr.bf16.mxu0 %v3064_v17  ;;  %v3084_v30 = vld [vmem:[#allocation5 + $0x204] ss:$16 sps:$4 sm:$0xff]   ;;  %v3087_v32 = vld [vmem:[#allocation5 + $0x200] ss:$16 sps:$4 sm:$0xff]  }
  0x2d   :  { %1346 = vmatprep.subr.bf16.mxu1 %v3066_v18  ;;  %v3088_v33 = vld [vmem:[#allocation5 + $0x1e4] ss:$16 sps:$4 sm:$0xff]   ;;  %v3092_v35 = vld [vmem:[#allocation5 + $0x1e0] ss:$16 sps:$4 sm:$0xff]  }
  0x2e   :  { %v3090_v34 = vld [vmem:[#allocation5 + $0x3e4] ss:$16 sps:$4 sm:$0xff]   ;;  %v3093_v36 = vld [vmem:[#allocation5 + $0x3e0] ss:$16 sps:$4 sm:$0xff]  }
  0x2f   :  { %1306 = vmatpush1.bf16.msra.mxu0 %v3068_v19  ;;  %v3094_v37 = vld [vmem:[#allocation5 + $0x1c4] ss:$16 sps:$4 sm:$0xff]   ;;  %v3098_v39 = vld [vmem:[#allocation5 + $0x1c0] ss:$16 sps:$4 sm:$0xff]   ;;  %v3145_v19 = vld [vmem:[#allocation5 + $0xe8] ss:$16 sps:$4 sm:$0xff]  }
  0x30   :  { %1347 = vmatpush1.bf16.msra.mxu1 %v3069_v20  ;;  %1307 = vmatprep.subr.bf16.mxu0 %v3070_v21  ;;  %v3096_v38 = vld [vmem:[#allocation5 + $0x3c4] ss:$16 sps:$4 sm:$0xff]   ;;  %v3099_v40 = vld [vmem:[#allocation5 + $0x3c0] ss:$16 sps:$4 sm:$0xff]  }
  0x31   :  { %1348 = vmatprep.subr.bf16.mxu1 %v3072_v22  ;;  %v3100_v41 = vld [vmem:[#allocation5 + $0x1a4] ss:$16 sps:$4 sm:$0xff]   ;;  %v3104_v43 = vld [vmem:[#allocation5 + $0x1a0] ss:$16 sps:$4 sm:$0xff]   ;;  %v3153_v22 = vld [vmem:[#allocation5 + $0xcc] ss:$16 sps:$4 sm:$0xff]  }
  0x32   :  { %v3102_v42 = vld [vmem:[#allocation5 + $0x3a4] ss:$16 sps:$4 sm:$0xff]   ;;  %v3105_v44 = vld [vmem:[#allocation5 + $0x3a0] ss:$16 sps:$4 sm:$0xff]  }
  0x33   :  { %1308 = vmatpush1.bf16.msra.mxu0 %v3074_v23  ;;  %v3106_v45 = vld [vmem:[#allocation5 + $0x184] ss:$16 sps:$4 sm:$0xff]   ;;  %v3110_v48 = vld [vmem:[#allocation5 + $0x180] ss:$16 sps:$4 sm:$0xff]  }
  0x34   :  { %1349 = vmatpush1.bf16.msra.mxu1 %v3075_v24  ;;  %1309 = vmatprep.subr.bf16.mxu0 %v3076_v25  ;;  %v3108_v46 = vld [vmem:[#allocation5 + $0x384] ss:$16 sps:$4 sm:$0xff]   ;;  %v3111_v49 = vld [vmem:[#allocation5 + $0x380] ss:$16 sps:$4 sm:$0xff]   ;;  %v3151_v24 = vld [vmem:[#allocation5 + $0xc8] ss:$16 sps:$4 sm:$0xff]  }
  0x35   :  { %1350 = vmatprep.subr.bf16.mxu1 %v3078_v26  ;;  %v3112_v52 = vld [vmem:[#allocation5 + $0x164] ss:$16 sps:$4 sm:$0xff]   ;;  %v3116_v55 = vld [vmem:[#allocation5 + $0x160] ss:$16 sps:$4 sm:$0xff]   ;;  %v3159_v26 = vld [vmem:[#allocation5 + $0xac] ss:$16 sps:$4 sm:$0xff]  }
  0x36   :  { %v3114_v54 = vld [vmem:[#allocation5 + $0x364] ss:$16 sps:$4 sm:$0xff]   ;;  %v3117_v56 = vld [vmem:[#allocation5 + $0x360] ss:$16 sps:$4 sm:$0xff]  }
  0x37   :  { %1310 = vmatpush1.bf16.msra.mxu0 %v3080_v27  ;;  %v3118_v57 = vld [vmem:[#allocation5 + $0x144] ss:$16 sps:$4 sm:$0xff]   ;;  %v3122_v59 = vld [vmem:[#allocation5 + $0x140] ss:$16 sps:$4 sm:$0xff]  }
  0x38   :  { %1351 = vmatpush1.bf16.msra.mxu1 %v3081_v28  ;;  %1311 = vmatprep.subr.bf16.mxu0 %v3082_v29  ;;  %v3120_v58 = vld [vmem:[#allocation5 + $0x344] ss:$16 sps:$4 sm:$0xff]   ;;  %v3123_v60 = vld [vmem:[#allocation5 + $0x340] ss:$16 sps:$4 sm:$0xff]   ;;  %v3157_v28 = vld [vmem:[#allocation5 + $0xa8] ss:$16 sps:$4 sm:$0xff]  }
  0x39   :  { %1352 = vmatprep.subr.bf16.mxu1 %v3084_v30  ;;  %v3124_v61 = vld [vmem:[#allocation5 + $0x124] ss:$16 sps:$4 sm:$0xff]   ;;  %v3128_v63 = vld [vmem:[#allocation5 + $0x120] ss:$16 sps:$4 sm:$0xff]   ;;  %v3165_v30 = vld [vmem:[#allocation5 + $0x8c] ss:$16 sps:$4 sm:$0xff]  }
  0x3a   :  { %v3126_v62 = vld [vmem:[#allocation5 + $0x324] ss:$16 sps:$4 sm:$0xff]   ;;  %v3129_v0 = vld [vmem:[#allocation5 + $0x320] ss:$16 sps:$4 sm:$0xff]  }
  0x3b   :  { %1312 = vmatpush1.bf16.msra.mxu0 %v3086_v31  ;;  %v3130_v1 = vld [vmem:[#allocation5 + $0x104] ss:$16 sps:$4 sm:$0xff]   ;;  %v3134_v4 = vld [vmem:[#allocation5 + $0x100] ss:$16 sps:$4 sm:$0xff]  }
  0x3c   :  { %1353 = vmatpush1.bf16.msra.mxu1 %v3087_v32  ;;  %1313 = vmatprep.subr.bf16.mxu0 %v3088_v33  ;;  %v3132_v3 = vld [vmem:[#allocation5 + $0x304] ss:$16 sps:$4 sm:$0xff]   ;;  %v3135_v5 = vld [vmem:[#allocation5 + $0x300] ss:$16 sps:$4 sm:$0xff]   ;;  %v3163_v32 = vld [vmem:[#allocation5 + $0x88] ss:$16 sps:$4 sm:$0xff]  }
  0x3d   :  { %1354 = vmatprep.subr.bf16.mxu1 %v3090_v34  ;;  %v81_v6 = vld [vmem:[%s4020_s18] sm:$0xff]  ;;  %v83_v7 = vld [vmem:[%s4020_s18 + $0x10] sm:$0xff]  ;;  %v3171_v34 = vld [vmem:[#allocation5 + $0x6c] ss:$16 sps:$4 sm:$0xff]  }
  0x3e   :  { %v3138_v8 = vld [vmem:[#allocation5 + $0x4e4] ss:$16 sps:$4 sm:$0xff]   ;;  %v3618_v10 = vpack.c.bf16 %v81_v6, %v81_v6  ;;  %v3620_v11 = vpack.c.bf16 %v83_v7, %v83_v7  ;;  %v3136_v12 = vld [vmem:[#allocation5 + $0x4e0] ss:$16 sps:$4 sm:$0xff]   ;;  %v3219_v6 = vld [vmem:[#allocation5 + $0x16c] ss:$16 sps:$4 sm:$0xff]  }
  0x3f   :  { %1314 = vmatpush2.bf16.msra.mxu0 %v3092_v35  ;;  %v3141_v9 = vld [vmem:[#allocation5 + $0x604] ss:$16 sps:$4 sm:$0xff]   ;;  %v3139_v13 = vld [vmem:[#allocation5 + $0x600] ss:$16 sps:$4 sm:$0xff]  }
  0x40   :  { %1355 = vmatpush2.bf16.msra.mxu1 %v3093_v36  ;;  %1315 = vmatprep.subr.bf16.mxu0 %v3094_v37  ;;  %v3144_v14 = vld [vmem:[#allocation5 + $0x4c4] ss:$16 sps:$4 sm:$0xff]   ;;  %v3142_v16 = vld [vmem:[#allocation5 + $0x4c0] ss:$16 sps:$4 sm:$0xff]   ;;  %v86_v36 = vld [vmem:[%s4020_s18 + $0x28] sm:$0xff] }
  0x41   :  { %1356 = vmatprep.subr.bf16.mxu1 %v3096_v38  ;;  %v87_v17 = vld [vmem:[%s4020_s18 + $0x30] sm:$0xff]  ;;  %v3636_v37 = vpack.c.bf16 %v86_v36, %v86_v36  ;;  %v3169_v38 = vld [vmem:[#allocation5 + $0x68] ss:$16 sps:$4 sm:$0xff]   ;;  %v3258_v36 = vld [vmem:[#allocation5 + $0x26c] ss:$16 sps:$4 sm:$0xff]  }
  0x42   :  { %v3150_v18 = vld [vmem:[#allocation5 + $0x4a4] ss:$16 sps:$4 sm:$0xff]   ;;  %v3628_v20 = vpack.c.bf16 %v87_v17, %v87_v17  ;;  %v3148_v21 = vld [vmem:[#allocation5 + $0x4a0] ss:$16 sps:$4 sm:$0xff]  }
  0x43   :  { %1316 = vmatpush2.bf16.msra.mxu0 %v3098_v39  ;;  %v3156_v23 = vld [vmem:[#allocation5 + $0x484] ss:$16 sps:$4 sm:$0xff]   ;;  %v3154_v25 = vld [vmem:[#allocation5 + $0x480] ss:$16 sps:$4 sm:$0xff]  }
  0x44   :  { %1357 = vmatpush2.bf16.msra.mxu1 %v3099_v40  ;;  %1317 = vmatprep.subr.bf16.mxu0 %v3100_v41  ;;  %v3162_v27 = vld [vmem:[#allocation5 + $0x464] ss:$16 sps:$4 sm:$0xff]   ;;  %v3160_v29 = vld [vmem:[#allocation5 + $0x460] ss:$16 sps:$4 sm:$0xff]   ;;  %v3177_v40 = vld [vmem:[#allocation5 + $0x4c] ss:$16 sps:$4 sm:$0xff]  }
  0x45   :  { %1358 = vmatprep.subr.bf16.mxu1 %v3102_v42  ;;  %v3168_v31 = vld [vmem:[#allocation5 + $0x444] ss:$16 sps:$4 sm:$0xff]   ;;  %v3166_v33 = vld [vmem:[#allocation5 + $0x440] ss:$16 sps:$4 sm:$0xff]   ;;  %v3175_v42 = vld [vmem:[#allocation5 + $0x48] ss:$16 sps:$4 sm:$0xff]  }
  0x46   :  { %v3174_v35 = vld [vmem:[#allocation5 + $0x424] ss:$16 sps:$4 sm:$0xff]   ;;  %v3172_v39 = vld [vmem:[#allocation5 + $0x420] ss:$16 sps:$4 sm:$0xff]  }
  0x47   :  { %1318 = vmatpush2.bf16.msra.mxu0 %v3104_v43  ;;  %v3180_v41 = vld [vmem:[#allocation5 + $0x404] ss:$16 sps:$4 sm:$0xff]   ;;  %v3178_v43 = vld [vmem:[#allocation5 + $0x400] ss:$16 sps:$4 sm:$0xff]  }
  0x48   :  { %1359 = vmatpush2.bf16.msra.mxu1 %v3105_v44  ;;  %1319 = vmatprep.subr.bf16.mxu0 %v3106_v45  ;;  %v3183_v44 = vld [vmem:[#allocation5 + $0x2c] ss:$16 sps:$4 sm:$0xff]   ;;  %v3186_v45 = vld [vmem:[#allocation5 + $0x5e4] ss:$16 sps:$4 sm:$0xff]   ;;  %v3184_v47 = vld [vmem:[#allocation5 + $0x5e0] ss:$16 sps:$4 sm:$0xff]  }
  0x49   :  { %1360 = vmatprep.subr.bf16.mxu1 %v3108_v46  ;;  %v3181_v46 = vld [vmem:[#allocation5 + $0x28] ss:$16 sps:$4 sm:$0xff]   ;;  %v3190_v51 = vld [vmem:[#allocation5 + $0x5c0] ss:$16 sps:$4 sm:$0xff]   ;;  %v3222_v7 = vld [vmem:[#allocation5 + $0x524] ss:$16 sps:$4 sm:$0xff]  }
  0x4a   :  { %v85_v17 = vld [vmem:[%s4020_s18 + $0x20] sm:$0xff] }
  0x4b   :  { %1320 = vmatpush2.bf16.msra.mxu0 %v3110_v48  ;;  %v3189_v48 = vld [vmem:[#allocation5 + $0xc] ss:$16 sps:$4 sm:$0xff]  }
  0x4c   :  { %1361 = vmatpush2.bf16.msra.mxu1 %v3111_v49  ;;  %1321 = vmatprep.subr.bf16.mxu0 %v3112_v52  ;;  %v3192_v49 = vld [vmem:[#allocation5 + $0x5c4] ss:$16 sps:$4 sm:$0xff]   ;;  %v3195_v52 = vld [vmem:[#allocation5 + $0x1ec] ss:$16 sps:$4 sm:$0xff]  }
  0x4d   :  { %1362 = vmatprep.subr.bf16.mxu1 %v3114_v54  ;;  %v3198_v54 = vld [vmem:[#allocation5 + $0x5a4] ss:$16 sps:$4 sm:$0xff]  }
  0x4f   :  { %1322 = vmatpush2.bf16.msra.mxu0 %v3116_v55  ;;  %v3193_v55 = vld [vmem:[#allocation5 + $0x1e8] ss:$16 sps:$4 sm:$0xff]  }
  0x50   :  { %1363 = vmatpush2.bf16.msra.mxu1 %v3117_v56  ;;  %1323 = vmatprep.subr.bf16.mxu0 %v3118_v57  ;;  %v3196_v56 = vld [vmem:[#allocation5 + $0x5a0] ss:$16 sps:$4 sm:$0xff]   ;;  %v3201_v57 = vld [vmem:[#allocation5 + $0x1cc] ss:$16 sps:$4 sm:$0xff]  }
  0x51   :  { %1364 = vmatprep.subr.bf16.mxu1 %v3120_v58  ;;  %v3204_v58 = vld [vmem:[#allocation5 + $0x584] ss:$16 sps:$4 sm:$0xff]  }
  0x53   :  { %1324 = vmatpush2.bf16.msra.mxu0 %v3122_v59  ;;  %v3199_v59 = vld [vmem:[#allocation5 + $0x1c8] ss:$16 sps:$4 sm:$0xff]  }
  0x54   :  { %1365 = vmatpush2.bf16.msra.mxu1 %v3123_v60  ;;  %1325 = vmatprep.subr.bf16.mxu0 %v3124_v61  ;;  %v3202_v60 = vld [vmem:[#allocation5 + $0x580] ss:$16 sps:$4 sm:$0xff]   ;;  %v3207_v61 = vld [vmem:[#allocation5 + $0x1ac] ss:$16 sps:$4 sm:$0xff]  }
  0x55   :  { %1366 = vmatprep.subr.bf16.mxu1 %v3126_v62  ;;  %v3210_v62 = vld [vmem:[#allocation5 + $0x564] ss:$16 sps:$4 sm:$0xff]  }
  0x57   :  { %1326 = vmatpush2.bf16.msra.mxu0 %v3128_v63  ;;  %v3205_v63 = vld [vmem:[#allocation5 + $0x1a8] ss:$16 sps:$4 sm:$0xff]  }
  0x58   :  { %1367 = vmatpush2.bf16.msra.mxu1 %v3129_v0  ;;  %1327 = vmatprep.subr.bf16.mxu0 %v3130_v1  ;;  %v3208_v0 = vld [vmem:[#allocation5 + $0x560] ss:$16 sps:$4 sm:$0xff]   ;;  %v3213_v1 = vld [vmem:[#allocation5 + $0x18c] ss:$16 sps:$4 sm:$0xff]  }
  0x59   :  { %1368 = vmatprep.subr.bf16.mxu1 %v3132_v3  ;;  %v3216_v3 = vld [vmem:[#allocation5 + $0x544] ss:$16 sps:$4 sm:$0xff]  }
  0x5b   :  { %1328 = vmatpush2.bf16.msra.mxu0 %v3134_v4  ;;  %v3211_v4 = vld [vmem:[#allocation5 + $0x188] ss:$16 sps:$4 sm:$0xff]  }
  0x5c   :  { %1369 = vmatpush2.bf16.msra.mxu1 %v3135_v5  ;;  %1379 = vmatprep.subr.bf16.mxu0 %v3138_v8  ;;  %v3214_v5 = vld [vmem:[#allocation5 + $0x540] ss:$16 sps:$4 sm:$0xff]   ;;  %v3217_v8 = vld [vmem:[#allocation5 + $0x168] ss:$16 sps:$4 sm:$0xff]  }
  0x5d   :  { %1434 = vmatprep.subr.bf16.mxu1 %v3141_v9  ;;  %v3220_v9 = vld [vmem:[#allocation5 + $0x520] ss:$16 sps:$4 sm:$0xff]  }
  0x5e   :  { %1330 = vmatmul.mubr.bf16.vlgmr.msra.gmra.mxu0 %v3618_v10 }
  0x5f   :  { %1371 = vmatmul.mubr.bf16.vlgmr.msra.gmra.mxu1 %v3620_v11  ;;  %1380 = vmatpush1.bf16.msra.mxu0 %v3136_v12  ;;  %v3225_v12 = vld [vmem:[#allocation5 + $0x14c] ss:$16 sps:$4 sm:$0xff]  }
  0x60   :  { %1435 = vmatpush1.bf16.msra.mxu1 %v3139_v13  ;;  %1381 = vmatprep.subr.bf16.mxu0 %v3144_v14  ;;  %v3228_v13 = vld [vmem:[#allocation5 + $0x504] ss:$16 sps:$4 sm:$0xff]   ;;  %v3223_v14 = vld [vmem:[#allocation5 + $0x148] ss:$16 sps:$4 sm:$0xff]  }
  0x61   :  { %1452 = vmatprep.mubr.bf16.mxu1 %v3504_v2  ;;  %1461 = vmatprep.subr.bf16.mxu1 %v3147_v15  ;;  %v3226_v15 = vld [vmem:[#allocation5 + $0x500] ss:$16 sps:$4 sm:$0xff]  }
  0x62   :  { %1411 = vmatprep.mubr.bf16.mxu0 %v3636_v37 }
  0x63   :  { %1382 = vmatpush1.bf16.msra.mxu0 %v3142_v16  ;;  %v3231_v16 = vld [vmem:[#allocation5 + $0x12c] ss:$16 sps:$4 sm:$0xff]  }
  0x64   :  { %1383 = vmatprep.subr.bf16.mxu0 %v3150_v18  ;;  %v3234_v18 = vld [vmem:[#allocation5 + $0x2ec] ss:$16 sps:$4 sm:$0xff]  }
  0x67   :  { %2841 = vmatmul.mubr.msk.bf16.vlgmr.msra.gmra.mxu1 %vm1293_vm0, %v3628_v20  ;;  %1384 = vmatpush1.bf16.msra.mxu0 %v3148_v21  ;;  %v3642_v21 = vpack.c.bf16 %v85_v17, %v85_v17  ;;  %v3321_v17 = vld [vmem:[#allocation5 + $0x54c] ss:$16 sps:$4 sm:$0xff]  }
  0x68   :  { %1462 = vmatpush1.bf16.msra.mxu1 %v3145_v19  ;;  %1385 = vmatprep.subr.bf16.mxu0 %v3156_v23  ;;  %v3229_v19 = vld [vmem:[#allocation5 + $0x128] ss:$16 sps:$4 sm:$0xff]   ;;  %v3237_v23 = vld [vmem:[#allocation5 + $0x10c] ss:$16 sps:$4 sm:$0xff]  }
  0x69   :  { %1463 = vmatprep.subr.bf16.mxu1 %v3153_v22  ;;  %1493 = vmatprep.mubr.bf16.mxu1 %v3603_v50  ;;  %v3187_v50 = vld [vmem:[#allocation5 + $0x8] ss:$16 sps:$4 sm:$0xff]  }
  0x6a   :  { %v3232_v22 = vld [vmem:[#allocation5 + $0x2e8] ss:$16 sps:$4 sm:$0xff]  }
  0x6b   :  { %1386 = vmatpush1.bf16.msra.mxu0 %v3154_v25  ;;  %v3235_v25 = vld [vmem:[#allocation5 + $0x108] ss:$16 sps:$4 sm:$0xff]  }
  0x6c   :  { %1464 = vmatpush1.bf16.msra.mxu1 %v3151_v24  ;;  %1387 = vmatprep.subr.bf16.mxu0 %v3162_v27  ;;  %v3240_v24 = vld [vmem:[#allocation5 + $0x2cc] ss:$16 sps:$4 sm:$0xff]  }
  0x6d   :  { %1465 = vmatprep.subr.bf16.mxu1 %v3159_v26  ;;  %v3238_v26 = vld [vmem:[#allocation5 + $0x2c8] ss:$16 sps:$4 sm:$0xff]   ;;  %v3243_v27 = vld [vmem:[#allocation5 + $0x4ec] ss:$16 sps:$4 sm:$0xff]  }
  0x6f   :  { %1388 = vmatpush1.bf16.msra.mxu0 %v3160_v29  ;;  %v3241_v29 = vld [vmem:[#allocation5 + $0x4e8] ss:$16 sps:$4 sm:$0xff]  }
  0x70   :  { %1466 = vmatpush1.bf16.msra.mxu1 %v3157_v28  ;;  %1389 = vmatprep.subr.bf16.mxu0 %v3168_v31  ;;  %v3246_v28 = vld [vmem:[#allocation5 + $0x2ac] ss:$16 sps:$4 sm:$0xff]  }
  0x71   :  { %1467 = vmatprep.subr.bf16.mxu1 %v3165_v30  ;;  %v3244_v30 = vld [vmem:[#allocation5 + $0x2a8] ss:$16 sps:$4 sm:$0xff]   ;;  %v3249_v31 = vld [vmem:[#allocation5 + $0x4cc] ss:$16 sps:$4 sm:$0xff]  }
  0x73   :  { %1390 = vmatpush1.bf16.msra.mxu0 %v3166_v33  ;;  %v3247_v33 = vld [vmem:[#allocation5 + $0x4c8] ss:$16 sps:$4 sm:$0xff]  }
  0x74   :  { %1468 = vmatpush1.bf16.msra.mxu1 %v3163_v32  ;;  %1391 = vmatprep.subr.bf16.mxu0 %v3174_v35  ;;  %v3252_v32 = vld [vmem:[#allocation5 + $0x28c] ss:$16 sps:$4 sm:$0xff]  }
  0x75   :  { %1469 = vmatprep.subr.bf16.mxu1 %v3171_v34  ;;  %v3250_v34 = vld [vmem:[#allocation5 + $0x288] ss:$16 sps:$4 sm:$0xff]   ;;  %v3255_v35 = vld [vmem:[#allocation5 + $0x4ac] ss:$16 sps:$4 sm:$0xff]  }
  0x77   :  { %1392 = vmatpush1.bf16.msra.mxu0 %v3172_v39  ;;  %v3261_v39 = vld [vmem:[#allocation5 + $0x48c] ss:$16 sps:$4 sm:$0xff]  }
  0x78   :  { %1470 = vmatpush1.bf16.msra.mxu1 %v3169_v38  ;;  %1393 = vmatprep.subr.bf16.mxu0 %v3180_v41  ;;  %v3253_v38 = vld [vmem:[#allocation5 + $0x4a8] ss:$16 sps:$4 sm:$0xff]  }
  0x79   :  { %1471 = vmatprep.subr.bf16.mxu1 %v3177_v40  ;;  %v3264_v40 = vld [vmem:[#allocation5 + $0x24c] ss:$16 sps:$4 sm:$0xff]   ;;  %v3259_v41 = vld [vmem:[#allocation5 + $0x488] ss:$16 sps:$4 sm:$0xff]  }
  0x7b   :  { %1394 = vmatpush1.bf16.msra.mxu0 %v3178_v43  ;;  %v3270_v43 = vld [vmem:[#allocation5 + $0x22c] ss:$16 sps:$4 sm:$0xff]  }
  0x7c   :  { %1472 = vmatpush1.bf16.msra.mxu1 %v3175_v42  ;;  %1395 = vmatprep.subr.bf16.mxu0 %v3186_v45  ;;  %v3267_v42 = vld [vmem:[#allocation5 + $0x46c] ss:$16 sps:$4 sm:$0xff]  }
  0x7d   :  { %1473 = vmatprep.subr.bf16.mxu1 %v3183_v44  ;;  %v3265_v44 = vld [vmem:[#allocation5 + $0x468] ss:$16 sps:$4 sm:$0xff]   ;;  %v3273_v45 = vld [vmem:[#allocation5 + $0x44c] ss:$16 sps:$4 sm:$0xff]  }
  0x7f   :  { %1396 = vmatpush2.bf16.msra.mxu0 %v3184_v47  ;;  %v3271_v47 = vld [vmem:[#allocation5 + $0x448] ss:$16 sps:$4 sm:$0xff]  }
  0x80   :  { %1474 = vmatpush1.bf16.msra.mxu1 %v3181_v46  ;;  %1397 = vmatprep.subr.bf16.mxu0 %v3192_v49  ;;  %v3276_v46 = vld [vmem:[#allocation5 + $0x20c] ss:$16 sps:$4 sm:$0xff]  }
  0x81   :  { %1475 = vmatprep.subr.bf16.mxu1 %v3189_v48  ;;  %v3274_v48 = vld [vmem:[#allocation5 + $0x208] ss:$16 sps:$4 sm:$0xff]   ;;  %v3279_v49 = vld [vmem:[#allocation5 + $0x42c] ss:$16 sps:$4 sm:$0xff]  }
  0x83   :  { %1398 = vmatpush2.bf16.msra.mxu0 %v3190_v51  ;;  %v3277_v51 = vld [vmem:[#allocation5 + $0x428] ss:$16 sps:$4 sm:$0xff]  }
  0x84   :  { %1476 = vmatpush1.bf16.msra.mxu1 %v3187_v50  ;;  %1399 = vmatprep.subr.bf16.mxu0 %v3198_v54  ;;  %v3282_v50 = vld [vmem:[#allocation5 + $0x3ec] ss:$16 sps:$4 sm:$0xff]  }
  0x85   :  { %1477 = vmatprep.subr.bf16.mxu1 %v3195_v52  ;;  %v3280_v52 = vld [vmem:[#allocation5 + $0x3e8] ss:$16 sps:$4 sm:$0xff]   ;;  %v3285_v54 = vld [vmem:[#allocation5 + $0x40c] ss:$16 sps:$4 sm:$0xff]  }
  0x87   :  { %1400 = vmatpush2.bf16.msra.mxu0 %v3196_v56  ;;  %v3283_v56 = vld [vmem:[#allocation5 + $0x408] ss:$16 sps:$4 sm:$0xff]  }
  0x88   :  { %1478 = vmatpush2.bf16.msra.mxu1 %v3193_v55  ;;  %1401 = vmatprep.subr.bf16.mxu0 %v3204_v58  ;;  %v3288_v55 = vld [vmem:[#allocation5 + $0x3cc] ss:$16 sps:$4 sm:$0xff]  }
  0x89   :  { %1479 = vmatprep.subr.bf16.mxu1 %v3201_v57  ;;  %v3286_v57 = vld [vmem:[#allocation5 + $0x3c8] ss:$16 sps:$4 sm:$0xff]   ;;  %v3291_v58 = vld [vmem:[#allocation5 + $0x5ec] ss:$16 sps:$4 sm:$0xff]  }
  0x8b   :  { %1402 = vmatpush2.bf16.msra.mxu0 %v3202_v60  ;;  %v3289_v60 = vld [vmem:[#allocation5 + $0x5e8] ss:$16 sps:$4 sm:$0xff]  }
  0x8c   :  { %1480 = vmatpush2.bf16.msra.mxu1 %v3199_v59  ;;  %1403 = vmatprep.subr.bf16.mxu0 %v3210_v62  ;;  %v3294_v59 = vld [vmem:[#allocation5 + $0x3ac] ss:$16 sps:$4 sm:$0xff]  }
  0x8d   :  { %1481 = vmatprep.subr.bf16.mxu1 %v3207_v61  ;;  %v3292_v61 = vld [vmem:[#allocation5 + $0x3a8] ss:$16 sps:$4 sm:$0xff]   ;;  %v3297_v62 = vld [vmem:[#allocation5 + $0x5cc] ss:$16 sps:$4 sm:$0xff]  }
  0x8f   :  { %1404 = vmatpush2.bf16.msra.mxu0 %v3208_v0  ;;  %v3295_v0 = vld [vmem:[#allocation5 + $0x5c8] ss:$16 sps:$4 sm:$0xff]  }
  0x90   :  { %1482 = vmatpush2.bf16.msra.mxu1 %v3205_v63  ;;  %1405 = vmatprep.subr.bf16.mxu0 %v3216_v3  ;;  %v3300_v63 = vld [vmem:[#allocation5 + $0x38c] ss:$16 sps:$4 sm:$0xff]  }
  0x91   :  { %1483 = vmatprep.subr.bf16.mxu1 %v3213_v1  ;;  %v3298_v1 = vld [vmem:[#allocation5 + $0x388] ss:$16 sps:$4 sm:$0xff]   ;;  %v3303_v3 = vld [vmem:[#allocation5 + $0x5ac] ss:$16 sps:$4 sm:$0xff]  }
  0x93   :  { %1406 = vmatpush2.bf16.msra.mxu0 %v3214_v5  ;;  %v3301_v5 = vld [vmem:[#allocation5 + $0x5a8] ss:$16 sps:$4 sm:$0xff]  }
  0x94   :  { %1484 = vmatpush2.bf16.msra.mxu1 %v3211_v4  ;;  %1407 = vmatprep.subr.bf16.mxu0 %v3222_v7  ;;  %v3306_v4 = vld [vmem:[#allocation5 + $0x36c] ss:$16 sps:$4 sm:$0xff]  }
  0x95   :  { %1485 = vmatprep.subr.bf16.mxu1 %v3219_v6  ;;  %v3304_v6 = vld [vmem:[#allocation5 + $0x368] ss:$16 sps:$4 sm:$0xff]   ;;  %v3309_v7 = vld [vmem:[#allocation5 + $0x58c] ss:$16 sps:$4 sm:$0xff]  }
  0x97   :  { %1408 = vmatpush2.bf16.msra.mxu0 %v3220_v9  ;;  %v3307_v9 = vld [vmem:[#allocation5 + $0x588] ss:$16 sps:$4 sm:$0xff]  }
  0x98   :  { %1486 = vmatpush2.bf16.msra.mxu1 %v3217_v8  ;;  %1409 = vmatprep.subr.bf16.mxu0 %v3228_v13  ;;  %v3312_v8 = vld [vmem:[#allocation5 + $0x34c] ss:$16 sps:$4 sm:$0xff]  }
  0x99   :  { %1487 = vmatprep.subr.bf16.mxu1 %v3225_v12  ;;  %v3310_v12 = vld [vmem:[#allocation5 + $0x348] ss:$16 sps:$4 sm:$0xff]   ;;  %v3315_v13 = vld [vmem:[#allocation5 + $0x56c] ss:$16 sps:$4 sm:$0xff]  }
  0x9b   :  { %1410 = vmatpush2.bf16.msra.mxu0 %v3226_v15  ;;  %v3313_v15 = vld [vmem:[#allocation5 + $0x568] ss:$16 sps:$4 sm:$0xff]  }
  0x9c   :  { %1488 = vmatpush2.bf16.msra.mxu1 %v3223_v14  ;;  %1502 = vmatprep.subr.bf16.mxu0 %v3234_v18  ;;  %v3318_v14 = vld [vmem:[#allocation5 + $0x32c] ss:$16 sps:$4 sm:$0xff]  }
  0x9d   :  { %1489 = vmatprep.subr.bf16.mxu1 %v3231_v16  ;;  %v3316_v16 = vld [vmem:[#allocation5 + $0x328] ss:$16 sps:$4 sm:$0xff]   ;;  %v3324_v18 = vld [vmem:[#allocation5 + $0x30c] ss:$16 sps:$4 sm:$0xff]  }
  0x9e   :  { %1412 = vmatmul.mubr.bf16.vlgmr.msra.gmra.mxu0 %v3642_v21 }
  0x9f   :  { %1503 = vmatpush1.bf16.msra.mxu0 %v3232_v22  ;;  %1534 = vmatprep.mubr.bf16.mxu0 %v3608_v53  ;;  %v3256_v53 = vld [vmem:[#allocation5 + $0x268] ss:$16 sps:$4 sm:$0xff]  }
  0xa0   :  { %1490 = vmatpush2.bf16.msra.mxu1 %v3229_v19  ;;  %1504 = vmatprep.subr.bf16.mxu0 %v3240_v24  ;;  %v3319_v19 = vld [vmem:[#allocation5 + $0x548] ss:$16 sps:$4 sm:$0xff]   ;;  %v3330_v24 = vld [vmem:[#allocation5 + $0x60c] ss:$16 sps:$4 sm:$0xff]  }
  0xa1   :  { %1491 = vmatprep.subr.bf16.mxu1 %v3237_v23  ;;  %v3322_v22 = vld [vmem:[#allocation5 + $0x308] ss:$16 sps:$4 sm:$0xff]   ;;  %v3327_v23 = vld [vmem:[#allocation5 + $0x52c] ss:$16 sps:$4 sm:$0xff]  }
  0xa3   :  { %1505 = vmatpush1.bf16.msra.mxu0 %v3238_v26  ;;  %v3328_v26 = vld [vmem:[#allocation5 + $0x608] ss:$16 sps:$4 sm:$0xff]  }
  0xa4   :  { %1492 = vmatpush2.bf16.msra.mxu1 %v3235_v25  ;;  %1506 = vmatprep.subr.bf16.mxu0 %v3246_v28  ;;  %v3325_v25 = vld [vmem:[#allocation5 + $0x528] ss:$16 sps:$4 sm:$0xff]   ;;  %v3336_v28 = vld [vmem:[%s4005_s4 + $0x74] ss:$8 sps:$4 sm:$0xff]  }
  0xa5   :  { %1543 = vmatprep.subr.bf16.mxu1 %v3243_v27  ;;  %v3333_v27 = vld [vmem:[#allocation5 + $0x50c] ss:$16 sps:$4 sm:$0xff]  }
  0xa7   :  { %1494 = vmatmul.mubr.bf16.vlgmr.msra.gmra.mxu1 %v3618_v10  ;;  %1507 = vmatpush1.bf16.msra.mxu0 %v3244_v30  ;;  %v3262_v10 = vld [vmem:[#allocation5 + $0x248] ss:$16 sps:$4 sm:$0xff]  }
  0xa8   :  { %1544 = vmatpush1.bf16.msra.mxu1 %v3241_v29  ;;  %1508 = vmatprep.subr.bf16.mxu0 %v3252_v32  ;;  %v3331_v29 = vld [vmem:[#allocation5 + $0x508] ss:$16 sps:$4 sm:$0xff]  }
  0xa9   :  { %1545 = vmatprep.subr.bf16.mxu1 %v3249_v31  ;;  %1575 = vmatprep.mubr.bf16.mxu1 %v3636_v37  ;;  %v3268_v37 = vld [vmem:[#allocation5 + $0x228] ss:$16 sps:$4 sm:$0xff]   ;;  %v3339_v31 = vld [vmem:[%s4005_s4 + $0x64] ss:$8 sps:$4 sm:$0xff]  }
  0xaa   :  { %v3334_v30 = vld [vmem:[%s4005_s4 + $0x70] ss:$8 sps:$4 sm:$0xff]  }
  0xab   :  { %1509 = vmatpush1.bf16.msra.mxu0 %v3250_v34  ;;  %v3340_v32 = vld [vmem:[%s4005_s4 + $0x50] ss:$8 sps:$4 sm:$0xff]   ;;  %v3387_v34 = vld [vmem:[%s4005_s4 + $0x164] ss:$8 sps:$4 sm:$0xff]  }
  0xac   :  { %1546 = vmatpush1.bf16.msra.mxu1 %v3247_v33  ;;  %1510 = vmatprep.subr.bf16.mxu0 %v3258_v36  ;;  %v3384_v33 = vld [vmem:[%s4005_s4 + $0x174] ss:$8 sps:$4 sm:$0xff]   ;;  %v3385_v36 = vld [vmem:[%s4005_s4 + $0x160] ss:$8 sps:$4 sm:$0xff]  }
  0xad   :  { %1547 = vmatprep.subr.bf16.mxu1 %v3255_v35  ;;  %v3343_v35 = vld [vmem:[%s4005_s4 + $0x40] ss:$8 sps:$4 sm:$0xff]  }
  0xaf   :  { %1511 = vmatpush1.bf16.msra.mxu0 %v3256_v53  ;;  %v3390_v53 = vld [vmem:[%s4005_s4 + $0x154] ss:$8 sps:$4 sm:$0xff]  }
  0xb0   :  { %1548 = vmatpush1.bf16.msra.mxu1 %v3253_v38  ;;  %1512 = vmatprep.subr.bf16.mxu0 %v3264_v40  ;;  %v3348_v38 = vld [vmem:[%s4005_s4 + $0x34] ss:$8 sps:$4 sm:$0xff]   ;;  %v3388_v40 = vld [vmem:[%s4005_s4 + $0x150] ss:$8 sps:$4 sm:$0xff]  }
  0xb1   :  { %1549 = vmatprep.subr.bf16.mxu1 %v3261_v39  ;;  %v3346_v39 = vld [vmem:[%s4005_s4 + $0x30] ss:$8 sps:$4 sm:$0xff]  }
  0xb3   :  { %1513 = vmatpush1.bf16.msra.mxu0 %v3262_v10  ;;  %v3393_v10 = vld [vmem:[%s4005_s4 + $0x144] ss:$8 sps:$4 sm:$0xff]  }
  0xb4   :  { %1550 = vmatpush1.bf16.msra.mxu1 %v3259_v41  ;;  %1514 = vmatprep.subr.bf16.mxu0 %v3270_v43  ;;  %v3351_v41 = vld [vmem:[%s4005_s4 + $0x24] ss:$8 sps:$4 sm:$0xff]   ;;  %v3391_v43 = vld [vmem:[%s4005_s4 + $0x140] ss:$8 sps:$4 sm:$0xff]  }
  0xb5   :  { %1551 = vmatprep.subr.bf16.mxu1 %v3267_v42  ;;  %v3349_v42 = vld [vmem:[%s4005_s4 + $0x20] ss:$8 sps:$4 sm:$0xff]  }
  0xb7   :  { %1515 = vmatpush1.bf16.msra.mxu0 %v3268_v37  ;;  %v3396_v37 = vld [vmem:[%s4005_s4 + $0x134] ss:$8 sps:$4 sm:$0xff]  }
  0xb8   :  { %1552 = vmatpush1.bf16.msra.mxu1 %v3265_v44  ;;  %1516 = vmatprep.subr.bf16.mxu0 %v3276_v46  ;;  %v3354_v44 = vld [vmem:[%s4005_s4 + $0x14] ss:$8 sps:$4 sm:$0xff]   ;;  %v3394_v46 = vld [vmem:[%s4005_s4 + $0x130] ss:$8 sps:$4 sm:$0xff]  }
  0xb9   :  { %1553 = vmatprep.subr.bf16.mxu1 %v3273_v45  ;;  %v3352_v45 = vld [vmem:[%s4005_s4 + $0x10] ss:$8 sps:$4 sm:$0xff]  }
  0xbb   :  { %1517 = vmatpush1.bf16.msra.mxu0 %v3274_v48  ;;  %v3399_v48 = vld [vmem:[%s4005_s4 + $0x124] ss:$8 sps:$4 sm:$0xff]  }
  0xbc   :  { %1554 = vmatpush1.bf16.msra.mxu1 %v3271_v47  ;;  %1518 = vmatprep.subr.bf16.mxu0 %v3282_v50  ;;  %v3357_v47 = vld [vmem:[%s4005_s4 + $0x4] ss:$8 sps:$4 sm:$0xff]   ;;  %v3397_v50 = vld [vmem:[%s4005_s4 + $0x120] ss:$8 sps:$4 sm:$0xff]  }
  0xbd   :  { %1555 = vmatprep.subr.bf16.mxu1 %v3279_v49  ;;  %v3355_v49 = vld [vmem:[%s4005_s4] ss:$8 sps:$4 sm:$0xff]  }
  0xbf   :  { %1519 = vmatpush2.bf16.msra.mxu0 %v3280_v52  ;;  %v3402_v52 = vld [vmem:[%s4005_s4 + $0x114] ss:$8 sps:$4 sm:$0xff]  }
  0xc0   :  { %1556 = vmatpush1.bf16.msra.mxu1 %v3277_v51  ;;  %1520 = vmatprep.subr.bf16.mxu0 %v3288_v55  ;;  %v3360_v51 = vld [vmem:[%s4005_s4 + $0xf4] ss:$8 sps:$4 sm:$0xff]   ;;  %v3400_v55 = vld [vmem:[%s4005_s4 + $0x110] ss:$8 sps:$4 sm:$0xff]  }
  0xc1   :  { %1557 = vmatprep.subr.bf16.mxu1 %v3285_v54  ;;  %v3358_v54 = vld [vmem:[%s4005_s4 + $0xf0] ss:$8 sps:$4 sm:$0xff]  }
  0xc3   :  { %1521 = vmatpush2.bf16.msra.mxu0 %v3286_v57  ;;  %v3405_v57 = vld [vmem:[%s4005_s4 + $0x104] ss:$8 sps:$4 sm:$0xff]  }
  0xc4   :  { %1558 = vmatpush1.bf16.msra.mxu1 %v3283_v56  ;;  %1522 = vmatprep.subr.bf16.mxu0 %v3294_v59  ;;  %v3363_v56 = vld [vmem:[%s4005_s4 + $0xe4] ss:$8 sps:$4 sm:$0xff]   ;;  %v3403_v59 = vld [vmem:[%s4005_s4 + $0x100] ss:$8 sps:$4 sm:$0xff]  }
  0xc5   :  { %1559 = vmatprep.subr.bf16.mxu1 %v3291_v58  ;;  %v3361_v58 = vld [vmem:[%s4005_s4 + $0xe0] ss:$8 sps:$4 sm:$0xff]  }
  0xc7   :  { %1523 = vmatpush2.bf16.msra.mxu0 %v3292_v61  ;;  %v3408_v61 = vld [vmem:[%s4005_s4 + $0x1f4] ss:$8 sps:$4 sm:$0xff]  }
  0xc8   :  { %1560 = vmatpush2.bf16.msra.mxu1 %v3289_v60  ;;  %1524 = vmatprep.subr.bf16.mxu0 %v3300_v63  ;;  %v3366_v60 = vld [vmem:[%s4005_s4 + $0xd4] ss:$8 sps:$4 sm:$0xff]   ;;  %v3406_v63 = vld [vmem:[%s4005_s4 + $0x1f0] ss:$8 sps:$4 sm:$0xff]  }
  0xc9   :  { %1561 = vmatprep.subr.bf16.mxu1 %v3297_v62  ;;  %v3364_v62 = vld [vmem:[%s4005_s4 + $0xd0] ss:$8 sps:$4 sm:$0xff]  }
  0xcb   :  { %1525 = vmatpush2.bf16.msra.mxu0 %v3298_v1  ;;  %v3411_v1 = vld [vmem:[%s4005_s4 + $0x1e4] ss:$8 sps:$4 sm:$0xff]  }
  0xcc   :  { %1562 = vmatpush2.bf16.msra.mxu1 %v3295_v0  ;;  %1526 = vmatprep.subr.bf16.mxu0 %v3306_v4  ;;  %v3369_v0 = vld [vmem:[%s4005_s4 + $0xc4] ss:$8 sps:$4 sm:$0xff]   ;;  %v3409_v4 = vld [vmem:[%s4005_s4 + $0x1e0] ss:$8 sps:$4 sm:$0xff]  }
  0xcd   :  { %1563 = vmatprep.subr.bf16.mxu1 %v3303_v3  ;;  %v3367_v3 = vld [vmem:[%s4005_s4 + $0xc0] ss:$8 sps:$4 sm:$0xff]  }
  0xcf   :  { %1527 = vmatpush2.bf16.msra.mxu0 %v3304_v6  ;;  %v3414_v6 = vld [vmem:[%s4005_s4 + $0x1d4] ss:$8 sps:$4 sm:$0xff]  }
  0xd0   :  { %1564 = vmatpush2.bf16.msra.mxu1 %v3301_v5  ;;  %1528 = vmatprep.subr.bf16.mxu0 %v3312_v8  ;;  %v3372_v5 = vld [vmem:[%s4005_s4 + $0xb4] ss:$8 sps:$4 sm:$0xff]   ;;  %v3412_v8 = vld [vmem:[%s4005_s4 + $0x1d0] ss:$8 sps:$4 sm:$0xff]  }
  0xd1   :  { %1565 = vmatprep.subr.bf16.mxu1 %v3309_v7  ;;  %v3370_v7 = vld [vmem:[%s4005_s4 + $0xb0] ss:$8 sps:$4 sm:$0xff]  }
  0xd3   :  { %1529 = vmatpush2.bf16.msra.mxu0 %v3310_v12  ;;  %v3373_v12 = vld [vmem:[%s4005_s4 + $0xa0] ss:$8 sps:$4 sm:$0xff]  }
  0xd4   :  { %1566 = vmatpush2.bf16.msra.mxu1 %v3307_v9  ;;  %1530 = vmatprep.subr.bf16.mxu0 %v3318_v14  ;;  %v3375_v9 = vld [vmem:[%s4005_s4 + $0xa4] ss:$8 sps:$4 sm:$0xff]   ;;  %v3376_v14 = vld [vmem:[%s4005_s4 + $0x90] ss:$8 sps:$4 sm:$0xff]  }
  0xd5   :  { %1567 = vmatprep.subr.bf16.mxu1 %v3315_v13  ;;  %v3378_v13 = vld [vmem:[%s4005_s4 + $0x94] ss:$8 sps:$4 sm:$0xff]  }
  0xd7   :  { %1531 = vmatpush2.bf16.msra.mxu0 %v3316_v16  ;;  %v3417_v16 = vld [vmem:[%s4005_s4 + $0x1c4] ss:$8 sps:$4 sm:$0xff]  }
  0xd8   :  { %1568 = vmatpush2.bf16.msra.mxu1 %v3313_v15  ;;  %1532 = vmatprep.subr.bf16.mxu0 %v3324_v18  ;;  %v3381_v15 = vld [vmem:[%s4005_s4 + $0x84] ss:$8 sps:$4 sm:$0xff]  }
  0xd9   :  { %1569 = vmatprep.subr.bf16.mxu1 %v3321_v17 }
  0xdb   :  { %1533 = vmatpush2.bf16.msra.mxu0 %v3322_v22  ;;  %v3379_v22 = vld [vmem:[%s4005_s4 + $0x80] ss:$8 sps:$4 sm:$0xff]  }
  0xdc   :  { %1570 = vmatpush2.bf16.msra.mxu1 %v3319_v19  ;;  %1598 = vmatprep.subr.bf16.mxu0 %v3330_v24  ;;  %v3415_v19 = vld [vmem:[%s4005_s4 + $0x1c0] ss:$8 sps:$4 sm:$0xff]  }
  0xdd   :  { %1571 = vmatprep.subr.bf16.mxu1 %v3327_v23 }
  0xde   :  { %1535 = vmatmul.mubr.bf16.vlgmr.msra.gmra.mxu0 %v3620_v11  ;;  %v3342_v11 = vld [vmem:[%s4005_s4 + $0x54] ss:$8 sps:$4 sm:$0xff]  }
  0xdf   :  { %1599 = vmatpush1.bf16.msra.mxu0 %v3328_v26  ;;  %1616 = vmatprep.mubr.bf16.mxu0 %v3504_v2  ;;  %v3337_v2 = vld [vmem:[%s4005_s4 + $0x60] ss:$8 sps:$4 sm:$0xff]  }
  0xe0   :  { %1572 = vmatpush2.bf16.msra.mxu1 %v3325_v25  ;;  %2039 = vmatprep.subr.bf16.mxu0 %v3336_v28  ;;  %v3420_v25 = vld [vmem:[%s4005_s4 + $0x1b4] ss:$8 sps:$4 sm:$0xff]   ;;  %v3418_v28 = vld [vmem:[%s4005_s4 + $0x1b0] ss:$8 sps:$4 sm:$0xff]  }
  0xe1   :  { %1573 = vmatprep.subr.bf16.mxu1 %v3333_v27 }
  0xe4   :  { %1574 = vmatpush2.bf16.msra.mxu1 %v3331_v29 }
  0xe5   :  { %2080 = vmatprep.subr.bf16.mxu1 %v3384_v33  ;;  %v3424_v33 = vld [vmem:[%s4005_s4 + $0x190] ss:$8 sps:$4 sm:$0xff]  }
  0xe6   :  { %2842 = vmatmul.mubr.msk.bf16.vlgmr.msra.gmra.mxu0 %vm1293_vm0, %v3628_v20  ;;  %v3345_v20 = vld [vmem:[%s4005_s4 + $0x44] ss:$8 sps:$4 sm:$0xff]  }
  0xe7   :  { %1576 = vmatmul.mubr.bf16.vlgmr.msra.gmra.mxu1 %v3642_v21  ;;  %2040 = vmatpush1.bf16.msra.mxu0 %v3334_v30  ;;  %v3382_v21 = vld [vmem:[%s4005_s4 + $0x170] ss:$8 sps:$4 sm:$0xff]  }
  0xe8   :  { %2041 = vmatprep.subr.bf16.mxu0 %v3339_v31  ;;  %2081 = vmatpush1.bf16.msra.mxu1 %v3382_v21  ;;  %v3423_v31 = vld [vmem:[%s4005_s4 + $0x1a4] ss:$8 sps:$4 sm:$0xff]  }
  0xe9   :  { %2082 = vmatprep.subr.bf16.mxu1 %v3387_v34 }
  0xeb   :  { %2042 = vmatpush1.bf16.msra.mxu0 %v3337_v2 }
  0xec   :  { %2043 = vmatprep.subr.bf16.mxu0 %v3342_v11  ;;  %2083 = vmatpush1.bf16.msra.mxu1 %v3385_v36  ;;  %v3421_v11 = vld [vmem:[%s4005_s4 + $0x1a0] ss:$8 sps:$4 sm:$0xff]  }
  0xed   :  { %2084 = vmatprep.subr.bf16.mxu1 %v3390_v53  ;;  %v3427_v36 = vld [vmem:[%s4005_s4 + $0x180] ss:$8 sps:$4 sm:$0xff]  }
  0xef   :  { %2044 = vmatpush1.bf16.msra.mxu0 %v3340_v32 }
  0xf0   :  { %2045 = vmatprep.subr.bf16.mxu0 %v3345_v20  ;;  %2085 = vmatpush1.bf16.msra.mxu1 %v3388_v40  ;;  %v3426_v20 = vld [vmem:[%s4005_s4 + $0x194] ss:$8 sps:$4 sm:$0xff]   ;;  %v291_v40 = vld [vmem:[%s4004_s3] sm:$0xf]  ;;  %s2935_s3 = sld [smem:[#allocation2 + $0x3]] }
  0xf1   :  { %2086 = vmatprep.subr.bf16.mxu1 %v3393_v10 }
  0xf3   :  { %2046 = vmatpush1.bf16.msra.mxu0 %v3343_v35  ;;  %v3429_v35 = vld [vmem:[%s4005_s4 + $0x184] ss:$8 sps:$4 sm:$0xff]   ;;  %s1625_s4 = sld [smem:[#allocation2]] }
  0xf4   :  { %2047 = vmatprep.subr.bf16.mxu0 %v3348_v38  ;;  %2087 = vmatpush1.bf16.msra.mxu1 %v3391_v43  ;;  %v293_v38 = vlaneseq }
  0xf5   :  { %2088 = vmatprep.subr.bf16.mxu1 %v3396_v37 }
  0xf6   :  { %v3846_v53 = vshrl.u32 %v293_v38, 7 }
  0xf7   :  { %2048 = vmatpush1.bf16.msra.mxu0 %v3346_v39 }
  0xf8   :  { %2049 = vmatprep.subr.bf16.mxu0 %v3351_v41  ;;  %2089 = vmatpush1.bf16.msra.mxu1 %v3394_v46  ;;  %v295_v39 = vsub.s32 0, %v3846_v53  ;;  %v299_v41 = vsub.s32 1, %v3846_v53 }
  0xf9   :  { %2090 = vmatprep.subr.bf16.mxu1 %v3399_v48  ;;  %v1630_v48 = vstv %s1625_s4 }
  0xfa   :  { %v296_v10 = vrot.slane %v291_v40, %v295_v39 }
  0xfb   :  { %2050 = vmatpush1.bf16.msra.mxu0 %v3349_v42  ;;  %v300_v42 = vrot.slane %v291_v40, %v299_v41 }
  0xfc   :  { %2051 = vmatprep.subr.bf16.mxu0 %v3354_v44  ;;  %2091 = vmatpush1.bf16.msra.mxu1 %v3397_v50 }
  0xfd   :  { %2092 = vmatprep.subr.bf16.mxu1 %v3402_v52 }
  0xff   :  { %2052 = vmatpush1.bf16.msra.mxu0 %v3352_v45 }
 0x100   :  { %2053 = vmatprep.subr.bf16.mxu0 %v3357_v47  ;;  %2093 = vmatpush1.bf16.msra.mxu1 %v3400_v55 }
 0x101   :  { %2094 = vmatprep.subr.bf16.mxu1 %v3405_v57 }
 0x103   :  { %2054 = vmatpush1.bf16.msra.mxu0 %v3355_v49 }
 0x104   :  { %2055 = vmatprep.subr.bf16.mxu0 %v3360_v51  ;;  %2095 = vmatpush1.bf16.msra.mxu1 %v3403_v59 }
 0x105   :  { %2096 = vmatprep.subr.bf16.mxu1 %v3408_v61 }
 0x107   :  { %2056 = vmatpush2.bf16.msra.mxu0 %v3358_v54 }
 0x108   :  { %2057 = vmatprep.subr.bf16.mxu0 %v3363_v56  ;;  %2097 = vmatpush2.bf16.msra.mxu1 %v3406_v63 }
 0x109   :  { %2098 = vmatprep.subr.bf16.mxu1 %v3411_v1 }
 0x10b   :  { %2058 = vmatpush2.bf16.msra.mxu0 %v3361_v58 }
 0x10c   :  { %2059 = vmatprep.subr.bf16.mxu0 %v3366_v60  ;;  %2099 = vmatpush2.bf16.msra.mxu1 %v3409_v4  ;;  %v307_v4 = vsub.s32 3, %v3846_v53 }
 0x10d   :  { %2100 = vmatprep.subr.bf16.mxu1 %v3414_v6 }
 0x10f   :  { %2060 = vmatpush2.bf16.msra.mxu0 %v3364_v62 }
 0x110   :  { %2061 = vmatprep.subr.bf16.mxu0 %v3369_v0  ;;  %2101 = vmatpush2.bf16.msra.mxu1 %v3412_v8  ;;  %v308_v8 = vrot.slane %v291_v40, %v307_v4  ;;  %v2124_v4 = vstv %s2907_s1  ;;  %s2942_s1 = sld [smem:[#allocation2 + $0x4]] }
 0x111   :  { %2102 = vmatprep.subr.bf16.mxu1 %v3417_v16 }
 0x113   :  { %2062 = vmatpush2.bf16.msra.mxu0 %v3367_v3  ;;  %v303_v3 = vsub.s32 2, %v3846_v53  ;;  %v3451_v53 = vld [vmem:[%s4009_s8 + $0x10] sm:$0xff]  }
 0x114   :  { %2063 = vmatprep.subr.bf16.mxu0 %v3372_v5  ;;  %2103 = vmatpush2.bf16.msra.mxu1 %v3415_v19 }
 0x115   :  { %2104 = vmatprep.subr.bf16.mxu1 %v3420_v25  ;;  %v304_v6 = vrot.slane %v291_v40, %v303_v3  ;;  %v3434_v40 = vld [vmem:[%s4007_s6 + $0x68] sm:$0xff]  }
 0x117   :  { %2064 = vmatpush2.bf16.msra.mxu0 %v3370_v7 }
 0x118   :  { %2065 = vmatprep.subr.bf16.mxu0 %v3375_v9  ;;  %2105 = vmatpush2.bf16.msra.mxu1 %v3418_v28 }
 0x119   :  { %2106 = vmatprep.subr.bf16.mxu1 %v3423_v31 }
 0x11b   :  { %2066 = vmatpush2.bf16.msra.mxu0 %v3373_v12 }
 0x11c   :  { %2067 = vmatprep.subr.bf16.mxu0 %v3378_v13  ;;  %2107 = vmatpush2.bf16.msra.mxu1 %v3421_v11 }
 0x11d   :  { %2108 = vmatprep.subr.bf16.mxu1 %v3426_v20 }
 0x11e   :  { %v1331_v17 = vpop.f32.mrf.mxu0 }
 0x11f   :  { %v1372_v18 = vpop.f32.mrf.mxu1  ;;  %2068 = vmatpush2.bf16.msra.mxu0 %v3376_v14  ;;  %v1332_v43 = vadd.f32 %v1331_v17, %v296_v10  ;;  %v3435_v10 = vld [vmem:[%s4007_s6 + $0x28] sm:$0xff]  }
 0x120   :  { %v1333_v23 = vpop.f32.mrf.mxu0  ;;  %2069 = vmatprep.subr.bf16.mxu0 %v3381_v15  ;;  %2109 = vmatpush2.bf16.msra.mxu1 %v3424_v33  ;;  %v3430_v33 = vld [vmem:[%s4007_s6 + $0x78] sm:$0xff]  }
 0x121   :  { %v1374_v24 = vpop.f32.mrf.mxu1  ;;  %2110 = vmatprep.subr.bf16.mxu1 %v3429_v35  ;;  %v1334_v44 = vadd.f32 %v1333_v23, %v300_v42  ;;  %v1373_v37 = vadd.f32 %v1372_v18, %v1332_v43  ;;  %v3432_v35 = vld [vmem:[%s4007_s6 + $0x70] sm:$0xff]   ;;  %v3436_v42 = vld [vmem:[%s4007_s6 + $0x60] sm:$0xff]  }
 0x122   :  { %v1335_v26 = vpop.f32.mrf.mxu0  ;;  %v3437_v43 = vld [vmem:[%s4007_s6 + $0x20] sm:$0xff]  }
 0x123   :  { %v1376_v27 = vpop.f32.mrf.mxu1  ;;  %2070 = vmatpush2.bf16.msra.mxu0 %v3379_v22  ;;  %v1375_v46 = vadd.f32 %v1374_v24, %v1334_v44  ;;  %v3438_v44 = vld [vmem:[%s4007_s6 + $0x58] sm:$0xff]  }
 0x124   :  { %v1336_v29 = vpop.f32.mrf.mxu0  ;;  %2111 = vmatpush2.bf16.msra.mxu1 %v3427_v36  ;;  %2951 = vmatprep.subr.bf16.mxu0 %v3430_v33  ;;  %v3433_v36 = vld [vmem:[%s4007_s6 + $0x30] sm:$0xff]  }
 0x125   :  { %v1377_v30 = vpop.f32.mrf.mxu1 }
 0x127   :  { %v1454_v2 = vpop.f32.mrf.mxu1 }
 0x129   :  { %v1456_v32 = vpop.f32.mrf.mxu1 }
 0x12b   :  { %v1458_v21 = vpop.f32.mrf.mxu1 }
 0x12d   :  { %v1459_v34 = vpop.f32.mrf.mxu1 }
 0x12e   :  { %v3431_v34 = vld [vmem:[%s4007_s6 + $0x38] sm:$0xff]  }
 0x15e   :  { %v1413_v45 = vpop.f32.mrf.mxu0 }
 0x15f   :  { %v1414_v47 = vadd.f32 %v1413_v45, %v1373_v37  ;;  %v3439_v37 = vld [vmem:[%s4007_s6 + $0x18] sm:$0xff]   ;;  %v3440_v45 = vld [vmem:[%s4007_s6 + $0x50] sm:$0xff]  }
 0x160   :  { %v1415_v49 = vpop.f32.mrf.mxu0 }
 0x161   :  { %v1455_v50 = vadd.f32 %v1454_v2, %v1414_v47  ;;  %v1416_v51 = vadd.f32 %v1415_v49, %v1375_v46  ;;  %v3441_v46 = vld [vmem:[%s4007_s6 + $0x10] sm:$0xff]   ;;  %v3442_v47 = vld [vmem:[%s4007_s6 + $0x48] sm:$0xff]   ;;  %v3444_v49 = vld [vmem:[%s4007_s6 + $0x40] sm:$0xff]  }
 0x162   :  { %v1417_v52 = vpop.f32.mrf.mxu0 }
 0x163   :  { %vm1626_vm1 = vcmp.gt.f32.partialorder %v1455_v50, 0.0  ;;  %v1631_v54 = vmul.f32 %v1630_v48, %v1455_v50  ;;  %v1457_v55 = vadd.f32 %v1456_v32, %v1416_v51  ;;  %v3446_v51 = vld [vmem:[%s4009_s8 + $0x38] sm:$0xff]   ;;  %v3505_v52 = vmov 0.0  }
 0x164   :  { %v1418_v56 = vpop.f32.mrf.mxu0  ;;  %2990 = vmatprep.subr.bf16.mxu1 %v3505_v52 }
 0x165   :  { %v1632_v57 = vmul.f32 %v1630_v48, %v1457_v55  ;;  %vm1627_vm2 = vcmp.gt.f32.partialorder %v1457_v55, 0.0  ;;  %v1635_v58 = vsel %vm1626_vm1, %v1455_v50, %v1631_v54  ;;  %v3445_v50 = vld [vmem:[%s4007_s6] sm:$0xff]   ;;  %v3447_v54 = vld [vmem:[%s4009_s8 + $0x30] sm:$0xff]  }
 0x166   :  { %v1639_v63 = vpack.c.bf16 %v1635_v58, %v1635_v58  ;;  %v3449_v56 = vld [vmem:[%s4009_s8 + $0x20] sm:$0xff]  }
 0x167   :  { %v1495_v59 = vpop.f32.mrf.mxu1  ;;  %v1636_v60 = vsel %vm1627_vm2, %v1457_v55, %v1632_v57  ;;  %v3448_v55 = vld [vmem:[%s4009_s8 + $0x28] sm:$0xff]   ;;  %v3450_v57 = vld [vmem:[%s4009_s8 + $0x18] sm:$0xff]  }
 0x168   :  { %v1640_v62 = vpack.c.bf16 %v1636_v60, %v1636_v60  ;;  %v1496_v12 = vadd.f32 %v1495_v59, %v304_v6 }
 0x169   :  { %v1497_v61 = vpop.f32.mrf.mxu1 }
 0x16a   :  { %2071 = vmatprep.mubr.bf16.mxu0 %v1640_v62  ;;  %v1498_v14 = vadd.f32 %v1497_v61, %v308_v8  ;;  %v1707_v62 = vld [vmem:[%s4006_s5] sm:$0x3] }
 0x16b   :  { %v1499_v0 = vpop.f32.mrf.mxu1  ;;  %2072 = vmatmul.mubr.bf16.vlgmr.msra.gmra.mxu0 %v1639_v63  ;;  %v1712_v63 = vrot.slane %v1707_v62, %v295_v39 }
 0x16c   :  { %2952 = vmatpush3.bf16.msra.mxu0 %v3431_v34  ;;  %v1716_v0 = vrot.slane %v1707_v62, %v299_v41  ;;  %v3452_v41 = vld [vmem:[%s4009_s8 + $0x8] sm:$0xff]   ;;  %v2425_v34 = vstv %s2935_s3 }
 0x16d   :  { %v1500_v1 = vpop.f32.mrf.mxu1  ;;  %2953 = vmatprep.subr.bf16.mxu0 %v3432_v35 }
 0x170   :  { %2954 = vmatpush3.bf16.msra.mxu0 %v3433_v36 }
 0x171   :  { %2955 = vmatprep.subr.bf16.mxu0 %v3434_v40 }
 0x174   :  { %2956 = vmatpush3.bf16.msra.mxu0 %v3435_v10 }
 0x175   :  { %2957 = vmatprep.subr.bf16.mxu0 %v3436_v42 }
 0x178   :  { %2958 = vmatpush3.bf16.msra.mxu0 %v3437_v43 }
 0x179   :  { %2959 = vmatprep.subr.bf16.mxu0 %v3438_v44 }
 0x17c   :  { %2960 = vmatpush3.bf16.msra.mxu0 %v3439_v37  ;;  %v3458_v37 = vld [vmem:[%s4013_s12 + $0x8] sm:$0xff]  }
 0x17d   :  { %2961 = vmatprep.subr.bf16.mxu0 %v3440_v45  ;;  %v3459_v45 = vld [vmem:[%s4013_s12] sm:$0xff]  }
 0x180   :  { %2962 = vmatpush3.bf16.msra.mxu0 %v3441_v46  ;;  %v2936_v46 = vld [vmem:[%s4012_s11] ss:$0 sm:$0xff] }
 0x181   :  { %2963 = vmatprep.subr.bf16.mxu0 %v3442_v47 }
 0x19e   :  { %v1536_v5 = vpop.f32.mrf.mxu0 }
 0x19f   :  { %v1537_v15 = vadd.f32 %v1536_v5, %v1496_v12 }
 0x1a0   :  { %v1538_v7 = vpop.f32.mrf.mxu0 }
 0x1a1   :  { %v1539_v18 = vadd.f32 %v1538_v7, %v1498_v14 }
 0x1a2   :  { %v1540_v9 = vpop.f32.mrf.mxu0 }
 0x1a4   :  { %v1541_v13 = vpop.f32.mrf.mxu0 }
 0x1a6   :  { %v1618_v17 = vpop.f32.mrf.mxu0 }
 0x1a7   :  { %v1577_v16 = vpop.f32.mrf.mxu1 }
 0x1a8   :  { %v1578_v19 = vadd.f32 %v1577_v16, %v1537_v15  ;;  %v1620_v23 = vpop.f32.mrf.mxu0 }
 0x1a9   :  { %v1579_v22 = vpop.f32.mrf.mxu1 }
 0x1aa   :  { %v1619_v24 = vadd.f32 %v1618_v17, %v1578_v19  ;;  %v1580_v25 = vadd.f32 %v1579_v22, %v1539_v18  ;;  %v1622_v27 = vpop.f32.mrf.mxu0  ;;  %v3453_v18 = vld [vmem:[%s4009_s8] sm:$0xff]   ;;  %v3454_v19 = vld [vmem:[%s4011_s10 + $0x18] sm:$0xff]   ;;  %v3455_v22 = vld [vmem:[%s4011_s10 + $0x10] sm:$0xff]   ;;  %s2925_s8 = sld [smem:[#allocation2 + $0x2]] }
 0x1ab   :  { %v1581_v26 = vpop.f32.mrf.mxu1 }
 0x1ac   :  { %vm1628_vm3 = vcmp.gt.f32.partialorder %v1619_v24, 0.0  ;;  %v1633_v28 = vmul.f32 %v1630_v48, %v1619_v24  ;;  %v1621_v29 = vadd.f32 %v1620_v23, %v1580_v25  ;;  %v1623_v31 = vpop.f32.mrf.mxu0 }
 0x1ad   :  { %v1582_v30 = vpop.f32.mrf.mxu1 }
 0x1ae   :  { %vm1629_vm4 = vcmp.gt.f32.partialorder %v1621_v29, 0.0  ;;  %v1634_v2 = vmul.f32 %v1630_v48, %v1621_v29  ;;  %v1637_v11 = vsel %vm1628_vm3, %v1619_v24, %v1633_v28  ;;  %v3443_v48 = vld [vmem:[%s4007_s6 + $0x8] sm:$0xff]   ;;  %v2908_v24 = vld [vmem:[%s4008_s7] ss:$0 sm:$0xff] }
 0x1af   :  { %v1641_v21 = vpack.c.bf16 %v1637_v11, %v1637_v11  ;;  %2964 = vmatpush3.bf16.msra.mxu0 %v3443_v48  ;;  %v2514_v48 = vstv %s2942_s1 }
 0x1b0   :  { %v1638_v32 = vsel %vm1629_vm4, %v1621_v29, %v1634_v2  ;;  %2965 = vmatprep.subr.bf16.mxu0 %v3444_v49  ;;  %v2308_v27 = vstv %s2925_s8 }
 0x1b1   :  { %v1642_v20 = vpack.c.bf16 %v1638_v32, %v1638_v32  ;;  %v3456_v32 = vld [vmem:[%s4011_s10 + $0x8] sm:$0xff]  }
 0x1b3   :  { %2112 = vmatprep.mubr.bf16.mxu1 %v1642_v20  ;;  %2966 = vmatpush3.bf16.msra.mxu0 %v3445_v50  ;;  %v3457_v20 = vld [vmem:[%s4011_s10] sm:$0xff]  }
 0x1b4   :  { %2113 = vmatmul.mubr.bf16.vlgmr.msra.gmra.mxu1 %v1641_v21  ;;  %3010 = vmatprep.subr.bf16.mxu0 %v3505_v52  ;;  %v2926_v21 = vld [vmem:[%s4010_s9] ss:$0 sm:$0xff] }
 0x1b5   :  { %2991 = vmatpush3.bf16.msra.mxu1 %v3446_v51  ;;  %3006 = vmatprep.mubr.msk.bf16.mxu1 %vm3506_vm7, %v3505_v52 }
 0x1b6   :  { %2992 = vmatprep.subr.bf16.mxu1 %v3505_v52 }
 0x1b9   :  { %2993 = vmatpush3.bf16.msra.mxu1 %v3447_v54 }
 0x1ba   :  { %2994 = vmatprep.subr.bf16.mxu1 %v3505_v52 }
 0x1bd   :  { %2995 = vmatpush3.bf16.msra.mxu1 %v3448_v55 }
 0x1be   :  { %2996 = vmatprep.subr.bf16.mxu1 %v3505_v52 }
 0x1c1   :  { %2997 = vmatpush3.bf16.msra.mxu1 %v3449_v56 }
 0x1c2   :  { %2998 = vmatprep.subr.bf16.mxu1 %v3505_v52 }
 0x1c5   :  { %2999 = vmatpush3.bf16.msra.mxu1 %v3450_v57  ;;  %v2943_v57 = vld [vmem:[%s4014_s13] ss:$0 sm:$0xff] }
 0x1c6   :  { %3000 = vmatprep.subr.bf16.mxu1 %v3505_v52 }
 0x1c9   :  { %3001 = vmatpush3.bf16.msra.mxu1 %v3451_v53 }
 0x1ca   :  { %3002 = vmatprep.subr.bf16.mxu1 %v3505_v52 }
 0x1cd   :  { %3003 = vmatpush3.bf16.msra.mxu1 %v3452_v41 }
 0x1ce   :  { %3004 = vmatprep.subr.bf16.mxu1 %v3505_v52 }
 0x1d1   :  { %3005 = vmatpush3.bf16.msra.mxu1 %v3453_v18 }
 0x1d2   :  { %3022 = vmatprep.subr.bf16.mxu1 %v3505_v52 }
 0x22b   :  { %v2073_v58 = vpop.f32.mrf.mxu0 }
 0x22c   :  { %v2074_v1 = vadd.f32 %v2073_v58, %v1712_v63 }
 0x22d   :  { %v2075_v59 = vpop.f32.mrf.mxu0 }
 0x22e   :  { %v2076_v5 = vadd.f32 %v2075_v59, %v1716_v0  ;;  %v2587_v59 = vstv %s2947_s30 }
 0x22f   :  { %v2077_v60 = vpop.f32.mrf.mxu0 }
 0x231   :  { %v2078_v61 = vpop.f32.mrf.mxu0 }
 0x274   :  { %v2114_v3 = vpop.f32.mrf.mxu1 }
 0x275   :  { %v2115_v6 = vadd.f32 %v2114_v3, %v2074_v1  ;;  %v3507_v3 = vmov 1  }
 0x276   :  { %v2116_v7 = vpop.f32.mrf.mxu1 }
 0x277   :  { %vm2122_vm5 = vcmp.gt.f32.partialorder %v2115_v6, 0.0  ;;  %v2125_v8 = vmul.f32 %v2124_v4, %v2115_v6  ;;  %v2117_v9 = vadd.f32 %v2116_v7, %v2076_v5  ;;  %v2621_v5 = vand.u32 127, %v293_v38  ;;  %v2949_v7 = vld [vmem:[%s4015_s14 + $0x1] ss:$0 sm:$0xff] }
 0x278   :  { %v2118_v12 = vpop.f32.mrf.mxu1 }
 0x279   :  { %vm2123_vm6 = vcmp.gt.f32.partialorder %v2117_v9, 0.0  ;;  %v2126_v13 = vmul.f32 %v2124_v4, %v2117_v9  ;;  %v2127_v14 = vsel %vm2122_vm5, %v2115_v6, %v2125_v8  ;;  %v2948_v6 = vld [vmem:[%s4015_s14] ss:$0 sm:$0xff]  ;;  %vm2622_vm14 = vcmp.ge.s32.totalorder %v2621_v5, 2 }
 0x27a   :  { %v2119_v15 = vpop.f32.mrf.mxu1  ;;  %v2129_v39 = vpack.c.bf16 %v2127_v14, %v2127_v14  ;;  %vm2623_vm15 = vcmp.lt.s32.totalorder %v2621_v5, 12  ;;  %vm2636_vm1 = vcmp.lt.s32.totalorder %v2621_v5, 2 }
 0x27b   :  { %v2128_v16 = vsel %vm2123_vm6, %v2117_v9, %v2126_v13  ;;  %v2950_v13 = vld [vmem:[%s4016_s15] ss:$0 sm:$0xff]  ;;  %vm2624_vm0 = vmand %vm2622_vm14, %vm2623_vm15 }
 0x27c   :  { %v2130_v17 = vpack.c.bf16 %v2128_v16, %v2128_v16 }
 0x27e   :  { %2298 = vmatprep.mubr.bf16.mxu0 %v2130_v17 }
 0x27f   :  { %2299 = vmatmul.mubr.bf16.vlgmr.msra.gmra.mxu0 %v2129_v39 }
 0x280   :  { %3018 = vmatprep.mubr.msk.bf16.mxu0 %vm3506_vm7, %v3505_v52  ;;  %3011 = vmatpush3.bf16.msra.mxu0 %v3454_v19 }
 0x281   :  { %3012 = vmatprep.subr.bf16.mxu0 %v3505_v52 }
 0x284   :  { %3013 = vmatpush3.bf16.msra.mxu0 %v3455_v22 }
 0x285   :  { %3014 = vmatprep.subr.bf16.mxu0 %v3505_v52 }
 0x288   :  { %3015 = vmatpush3.bf16.msra.mxu0 %v3456_v32 }
 0x289   :  { %3016 = vmatprep.subr.bf16.mxu0 %v3505_v52 }
 0x28c   :  { %3017 = vmatpush3.bf16.msra.mxu0 %v3457_v20 }
 0x33f   :  { %v2967_v23 = vpop.f32.mrf.mxu0 }
 0x341   :  { %v2968_v25 = vpop.f32.mrf.mxu0 }
 0x342   :  { %v2969_v26 = vadd.f32 %v2968_v25, %v2967_v23 }
 0x343   :  { %v2970_v28 = vpop.f32.mrf.mxu0 }
 0x344   :  { %v2301_v29 = vadd.f32 %v2969_v26, %v2908_v24 }
 0x345   :  { %v2971_v30 = vpop.f32.mrf.mxu0 }
 0x346   :  { %vm2307_vm8 = vcmp.gt.f32.partialorder %v2301_v29, 0.0  ;;  %v2309_v31 = vmul.f32 %v2308_v27, %v2301_v29 }
 0x348   :  { %v2310_v2 = vsel %vm2307_vm8, %v2301_v29, %v2309_v31 }
 0x349   :  { %v2311_v11 = vpack.c.bf16 %v2310_v2, %v2310_v2 }
 0x34b   :  { %3007 = vmatmul.mubr.bf16.vlgmr.msra.gmra.mxu1 %v2311_v11 }
 0x34c   :  { %3026 = vmatprep.mubr.msk.bf16.mxu1 %vm3506_vm7, %v3505_v52  ;;  %3023 = vmatpush3.bf16.msra.mxu1 %v3458_v37 }
 0x34d   :  { %3024 = vmatprep.subr.bf16.mxu1 %v3505_v52 }
 0x350   :  { %3025 = vmatpush3.bf16.msra.mxu1 %v3459_v45 }
 0x40b   :  { %v2417_v33 = vpop.f32.mrf.mxu1 }
 0x40c   :  { %v2418_v35 = vadd.f32 %v2926_v21, %v2417_v33 }
 0x40d   :  { %v3008_v36 = vpop.f32.mrf.mxu1 }
 0x40e   :  { %vm2424_vm9 = vcmp.gt.f32.partialorder %v2418_v35, 0.0  ;;  %v2426_v40 = vmul.f32 %v2425_v34, %v2418_v35 }
 0x40f   :  { %v2420_v10 = vpop.f32.mrf.mxu1 }
 0x410   :  { %v2427_v42 = vsel %vm2424_vm9, %v2418_v35, %v2426_v40 }
 0x411   :  { %v2428_v43 = vpack.c.bf16 %v2427_v42, %v2427_v42  ;;  %v3009_v44 = vpop.f32.mrf.mxu1 }
 0x413   :  { %3019 = vmatmul.mubr.msk.bf16.vlgmr.msra.gmra.mxu0 %vm2468_vm10, %v2428_v43 }
 0x4d3   :  { %v2506_v47 = vpop.f32.mrf.mxu0 }
 0x4d4   :  { %v2507_v49 = vadd.f32 %v2936_v46, %v2506_v47 }
 0x4d5   :  { %v3020_v50 = vpop.f32.mrf.mxu0 }
 0x4d6   :  { %vm2513_vm11 = vcmp.gt.f32.partialorder %v2507_v49, 0.0  ;;  %v2515_v51 = vmul.f32 %v2514_v48, %v2507_v49 }
 0x4d7   :  { %v2509_v54 = vpop.f32.mrf.mxu0 }
 0x4d8   :  { %v2516_v55 = vsel %vm2513_vm11, %v2507_v49, %v2515_v51 }
 0x4d9   :  { %v2517_v52 = vpack.c.bf16 %v2516_v55, %v2516_v55  ;;  %v3021_v56 = vpop.f32.mrf.mxu0 }
 0x4db   :  { %3027 = vmatmul.mubr.msk.bf16.vlgmr.msra.gmra.mxu1 %vm2541_vm12, %v2517_v52 }
 0x59b   :  { %v2579_v58 = vpop.f32.mrf.mxu1 }
 0x59c   :  { %v2580_v60 = vadd.f32 %v2943_v57, %v2579_v58 }
 0x59d   :  { %v3028_v61 = vpop.f32.mrf.mxu1 }
 0x59e   :  { %vm2586_vm13 = vcmp.gt.f32.partialorder %v2580_v60, 0.0  ;;  %v2588_v62 = vmul.f32 %v2587_v59, %v2580_v60 }
 0x59f   :  { %v2582_v63 = vpop.f32.mrf.mxu1 }
 0x5a0   :  { %v2589_v0 = vsel %vm2586_vm13, %v2580_v60, %v2588_v62 }
 0x5a1   :  { %2593 = vperm.xlu0 %3038, %v2589_v0   ;;  %v3029_v1 = vpop.f32.mrf.mxu1 }
 0x5a5   :  { %3039 = vset.pattern.permute.xlu0 %v3507_v3 }
 0x5a6   :  { %2603 = vperm.xlu0 %3039, %v2589_v0  }
 0x61c   :  { %v2594_v4 = vpop.permute.xlu0 %2593 }
 0x61d   :  { %v2600_v9 = vmul.f32 %v2948_v6, %v2594_v4 }
 0x621   :  { %v2604_v8 = vpop.permute.xlu0 %2603 }
 0x622   :  { %v2610_v12 = vmul.f32 %v2949_v7, %v2604_v8 }
 0x624   :  { %v2611_v14 = vadd.f32 %v2610_v12, %v2600_v9 }
 0x626   :  { %v2619_v38 = vadd.f32 %v2950_v13, %v2611_v14 }
 0x628   :  { %v2625_v15 = vsel %vm2624_vm0, %v2619_v38, -1e+30 }
 0x629   :  { %2626 = vmax.xlane.f32.xlu1 %v2625_v15 }
 0x6b2   :  { %v2627_v16 = vpop.xlane.xlu1 %2626 }
 0x6b3   :  { %v2628_v17 = vsub.f32 %v2625_v15, %v2627_v16 }
 0x6b5   :  { %v2629_v39 = vmul.f32 1.442695, %v2628_v17 }
 0x6b7   :  { %3460 = vpow2.f32 %v2629_v39 }
 0x6c4   :  { %v3461_v53 = vpop.eup %3460 }
 0x6c5   :  { %2631 = vadd.xlane.f32.xlu1 %v3461_v53 }
 0x74e   :  { %v2632_v41 = vpop.xlane.xlu1 %2631 }
 0x74f   :  { %3462 = vlog2.f32 %v2632_v41 }
 0x75c   :  { %v3463_v18 = vpop.eup %3462 }
 0x75d   :  { %v2634_v19 = vmul.f32 0.6931472, %v3463_v18 }
 0x75f   :  { %v2635_v22 = vsub.f32 %v2628_v17, %v2634_v19 }
 0x761   :  { %v2637_v23 = vsel %vm2636_vm1, %v2580_v60, %v2635_v22 }
 0x762   :  { %2638 = vst [vmem:[%s4017_s16] sm:$0xff] %v2637_v23 }
 0x763   :  { %2643 = vsyncpa [#allocation3], 1 }
 0x764   :  { %2644 = vsyncpa [#allocation4], 1 }

</bundles_post_ra>
